<compile_context>
chip_gen: v5e
topology: v5e:2x2
jax: 0.10.0
libtpu: 0.0.40
codegen_flags: <defaults>
</compile_context>

<pallas_src>
import functools

import jax
import jax.numpy as jnp
from jax import lax
from jax.experimental import pallas as pl
from jax.experimental.pallas import tpu as pltpu


def _round_up(x, m):
    return ((x + m - 1) // m) * m


# ----------------------------------------------------------------------------
# Fused training-loop kernel: single invocation, in-kernel epoch loop.
# ----------------------------------------------------------------------------
def _make_trainer_kernel(lr, inv_nt, inv_nv, epochs):
    lr = float(lr)
    inv_nt = float(inv_nt)   # 1 / (B_train * OUT), ORIGINAL (unpadded) counts
    inv_nv = float(inv_nv)   # 1 / (B_val   * OUT)

    def kernel(xt_ref, yt_ref, xv_ref, yv_ref, w0_ref,
               loss_ref, vloss_ref, w_ref):
        # Whole (padded, lane-dense) arrays, VMEM-resident for the entire run.
        xt = xt_ref[...]     # (Bt, Fp)  with folded-bias ones column
        yt = yt_ref[...]     # (Bt, Op)
        xv = xv_ref[...]     # (Bv, Fp)
        yv = yv_ref[...]     # (Bv, Op)

        def epoch_body(e, w):
            # --- model.train(): forward + MSE loss (recorded pre-update, as in
            # the Torch trainer where loss[epoch] is taken before optimizer.step)
            logits = jnp.dot(xt, w, preferred_element_type=jnp.float32)
            diff = logits - yt
            loss_ref[e] = jnp.sum(diff * diff) * inv_nt

            # --- loss.backward(): analytic MSE gradient.  Contract axis 0 of
            # both operands so the MXU consumes X in its stored layout; the
            # folded-bias ones column makes the last used row of gw equal to
            # grad_b, so one matmul yields both gradients.
            gw = lax.dot_general(
                xt, diff, (((0,), (0,)), ((), ())),
                preferred_element_type=jnp.float32) * (2.0 * inv_nt)

            # --- optimizer.step(): plain SGD on the loop-carried parameters.
            w_new = w - lr * gw

            # --- model.eval(): validation forward with the updated parameters.
            vlogits = jnp.dot(xv, w_new, preferred_element_type=jnp.float32)
            vdiff = vlogits - yv
            vloss_ref[e] = jnp.sum(vdiff * vdiff) * inv_nv
            return w_new

        # Fully unroll small epoch counts so adjacent epochs' matmuls overlap.
        unroll = epochs if epochs <= 32 else 8
        w_final = lax.fori_loop(0, epochs, epoch_body, w0_ref[...],
                                unroll=unroll)
        w_ref[...] = w_final

    return kernel


@functools.partial(jax.jit, static_argnames=("lr", "epochs"))
def run_training(x_train, y_train, x_val, y_val, w0, b0, *, lr, epochs):
    """One kernel launch for the entire training run.

    Returns (loss[epochs], valid_loss[epochs], final_W, final_b).
    """
    b_tr, feat = x_train.shape
    out = w0.shape[1]
    b_va = x_val.shape[0]

    # Lane-dense padded shapes: last dims -> multiples of 128, batch -> 8.
    fp = _round_up(feat + 1, 128)      # +1 for the folded-bias ones column
    op = _round_up(out, 128)
    btp = _round_up(b_tr, 8)
    bvp = _round_up(b_va, 8)

    def pad_x(x, bp):
        b = x.shape[0]
        xa = jnp.zeros((bp, fp), jnp.float32)
        xa = xa.at[:b, :feat].set(x.astype(jnp.float32))
        xa = xa.at[:b, feat].set(1.0)            # bias column (only real rows)
        return xa

    def pad_y(y, bp):
        b = y.shape[0]
        ya = jnp.zeros((bp, op), jnp.float32)
        return ya.at[:b, :out].set(y.astype(jnp.float32))

    xt = pad_x(x_train, btp)
    yt = pad_y(y_train, btp)
    xv = pad_x(x_val, bvp)
    yv = pad_y(y_val, bvp)

    # Augmented parameter matrix: rows [0:feat] = W, row feat = b, rest zero.
    w_aug = jnp.zeros((fp, op), jnp.float32)
    w_aug = w_aug.at[:feat, :out].set(w0.astype(jnp.float32))
    w_aug = w_aug.at[feat, :out].set(b0.reshape(-1).astype(jnp.float32))

    # MSE "mean" normalizers use the ORIGINAL (unpadded) element counts.
    inv_nt = 1.0 / float(b_tr * out)
    inv_nv = 1.0 / float(b_va * out)

    kernel = _make_trainer_kernel(lr, inv_nt, inv_nv, epochs)

    vmem = pl.BlockSpec(memory_space=pltpu.MemorySpace.VMEM)
    smem = pl.BlockSpec(memory_space=pltpu.MemorySpace.SMEM)

    # Advisory cost hint: train fwd + grad matmul + eval fwd per epoch.
    flops_per_epoch = 2 * btp * fp * op * 2 + 2 * bvp * fp * op
    resident_bytes = 4 * (xt.size + yt.size + xv.size + yv.size + 2 * w_aug.size)
    bytes_accessed = resident_bytes + 4 * 2 * epochs
    vmem_limit = int(min(max(2 * resident_bytes + (4 << 20), 16 << 20), 96 << 20))

    loss, vloss, w_fin_aug = pl.pallas_call(
        kernel,
        in_specs=[vmem, vmem, vmem, vmem, vmem],
        out_specs=(smem, smem, vmem),
        out_shape=(
            jax.ShapeDtypeStruct((epochs,), jnp.float32),   # loss
            jax.ShapeDtypeStruct((epochs,), jnp.float32),   # valid_loss
            jax.ShapeDtypeStruct((fp, op), jnp.float32),    # final augmented W
        ),
        compiler_params=pltpu.CompilerParams(vmem_limit_bytes=vmem_limit),
        cost_estimate=pl.CostEstimate(
            flops=epochs * flops_per_epoch,
            transcendentals=0,
            bytes_accessed=bytes_accessed),
    )(xt, yt, xv, yv, w_aug)

    w_fin = w_fin_aug[:feat, :out]
    b_fin = w_fin_aug[feat:feat + 1, :out]
    return loss, vloss, w_fin, b_fin


# ----------------------------------------------------------------------------
# Trainer wrapper mirroring Torch_Trainer.forward
# ----------------------------------------------------------------------------
class PallasTrainer:
    def __init__(self, params, data_sampler, lr=0.05, epochs=5, **kwargs):
        self.params = dict(params)            # {"w": (F,O), "b": (1,O)}
        self.data_sampler = data_sampler      # (X_train, y_train, X_val, y_val, hidden)
        self.lr = lr
        self.epochs = epochs
        self.save_model = kwargs.get("save_model", False)
        self.loss_step = kwargs.get("loss_step", 1)
        self.verbose = kwargs.get("verbose", False)
        self.is_visualize = kwargs.get("is_visualize", False)
        self.loss = jnp.zeros((self.epochs,), dtype=jnp.float32)
        self.valid_loss = jnp.zeros((self.epochs,), dtype=jnp.float32)

    def forward(self):
        X_train, y_train, X_validation, y_validation, hidden = self.data_sampler
        # hidden is None branch of the original trainer (linear model + MSE + SGD).
        loss, valid_loss, w_fin, b_fin = run_training(
            X_train, y_train, X_validation, y_validation,
            self.params["w"], self.params["b"],
            lr=self.lr, epochs=self.epochs)
        self.loss, self.valid_loss = loss, valid_loss
        self.params["w"], self.params["b"] = w_fin, b_fin
        if self.verbose:
            loss_h = jax.device_get(loss)
            vloss_h = jax.device_get(valid_loss)
            for epoch in range(0, self.epochs, self.loss_step):
                print(f"\nStep:{epoch}| Training Loss:{loss_h[epoch]}"
                      f"| Validation_loss:{vloss_h[epoch]}")
            print("\nTraining Finished...")
            print(f"Final Loss| Training Loss:{loss_h[-1]}"
                  f"| Validation_loss:{vloss_h[-1]}")
        # TODO(synk): visualize_training (matplotlib) and torch.save have no
        # Pallas equivalent; plotting / checkpointing are intentionally omitted.
        return self.loss, self.valid_loss


# ----------------------------------------------------------------------------
# Main
# ----------------------------------------------------------------------------
if __name__ == "__main__":
    BATCH, FEAT, OUT, EPOCHS = 8, 32, 16, 5

    key = jax.random.PRNGKey(0)
    k1, k2, k3, k4, k5 = jax.random.split(key, 5)

    # Deterministic synthetic regression data: y = X @ W_true + noise
    w_true = jax.random.normal(k1, (FEAT, OUT), dtype=jnp.float32) * 0.5
    X_train = jax.random.normal(k2, (BATCH, FEAT), dtype=jnp.float32)
    y_train = X_train @ w_true + 0.01 * jax.random.normal(k3, (BATCH, OUT), jnp.float32)
    X_val = jax.random.normal(k4, (BATCH, FEAT), dtype=jnp.float32)
    y_val = X_val @ w_true + 0.01 * jax.random.normal(k5, (BATCH, OUT), jnp.float32)

    # Deterministic parameter init (zeros), like a fresh linear layer pre-fit.
    params = {
        "w": jnp.zeros((FEAT, OUT), dtype=jnp.float32),
        "b": jnp.zeros((1, OUT), dtype=jnp.float32),
    }

    data_sampler = (X_train, y_train, X_val, y_val, None)  # hidden = None
    trainer = PallasTrainer(
        params, data_sampler, lr=0.05, epochs=EPOCHS,
        save_model=False, loss_step=2, verbose=False, is_visualize=False,
    )

    loss, valid_loss = trainer.forward()
    loss = jax.block_until_ready(loss)
    valid_loss = jax.block_until_ready(valid_loss)

    # Sanity: losses are finite, the right shape, and training loss decreases.
    assert loss.shape == (EPOCHS,) and valid_loss.shape == (EPOCHS,)
    assert bool(jnp.all(jnp.isfinite(loss))) and bool(jnp.all(jnp.isfinite(valid_loss)))
    assert float(loss[-1]) < float(loss[0])
    assert trainer.params["w"].shape == (FEAT, OUT)
    assert trainer.params["b"].shape == (1, OUT)

    print("KERNEL_OK")
</pallas_src>

<mosaic_0001>
module attributes {stable_mosaic.version = 11 : i64} {
  func.func @kernel(%arg0: memref<8x128xf32, #tpu.memory_space<vmem>>, %arg1: memref<8x128xf32, #tpu.memory_space<vmem>>, %arg2: memref<8x128xf32, #tpu.memory_space<vmem>>, %arg3: memref<8x128xf32, #tpu.memory_space<vmem>>, %arg4: memref<128x128xf32, #tpu.memory_space<vmem>>, %arg5: memref<5xf32, #tpu.memory_space<smem>>, %arg6: memref<5xf32, #tpu.memory_space<smem>>, %arg7: memref<128x128xf32, #tpu.memory_space<vmem>>) attributes {dimension_semantics = [], scalar_prefetch = 0 : i64, scratch_operands = 0 : i64, tpu.core_type = #tpu.core_type<tc>} {
    %c0 = arith.constant 0 : index
    %c0_0 = arith.constant 0 : index
    %0 = vector.load %arg0[%c0, %c0_0] : memref<8x128xf32, #tpu.memory_space<vmem>>, vector<8x128xf32>
    %c0_1 = arith.constant 0 : index
    %c0_2 = arith.constant 0 : index
    %1 = vector.load %arg1[%c0_1, %c0_2] : memref<8x128xf32, #tpu.memory_space<vmem>>, vector<8x128xf32>
    %c0_3 = arith.constant 0 : index
    %c0_4 = arith.constant 0 : index
    %2 = vector.load %arg2[%c0_3, %c0_4] : memref<8x128xf32, #tpu.memory_space<vmem>>, vector<8x128xf32>
    %c0_5 = arith.constant 0 : index
    %c0_6 = arith.constant 0 : index
    %3 = vector.load %arg3[%c0_5, %c0_6] : memref<8x128xf32, #tpu.memory_space<vmem>>, vector<8x128xf32>
    %c0_7 = arith.constant 0 : index
    %c0_8 = arith.constant 0 : index
    %4 = vector.load %arg4[%c0_7, %c0_8] : memref<128x128xf32, #tpu.memory_space<vmem>>, vector<128x128xf32>
    %c0_i32 = arith.constant 0 : i32
    %cst = arith.constant dense<0.000000e+00> : vector<8x128xf32>
    %5 = tpu.matmul %0, %4, %cst {dimension_numbers = #tpu.dot_dimension_numbers<[1], [0], [0], [1], [0, 0, 1, 1], [], []>} : vector<8x128xf32>, vector<128x128xf32>, vector<8x128xf32> -> vector<8x128xf32>
    %6 = arith.subf %5, %1 : vector<8x128xf32>
    %7 = arith.mulf %6, %6 : vector<8x128xf32>
    %8 = vector.shape_cast %7 : vector<8x128xf32> to vector<1x8x128xf32>
    %cst_9 = arith.constant dense<0.000000e+00> : vector<1xf32>
    %9 = vector.multi_reduction <add>, %8, %cst_9 [1, 2] : vector<1x8x128xf32> to vector<1xf32>
    %10 = vector.shape_cast %9 : vector<1xf32> to vector<1x1x1xf32>
    %11 = vector.extract %10[0, 0, 0] : f32 from vector<1x1x1xf32>
    %cst_10 = arith.constant 7.812500e-03 : f32
    %12 = arith.mulf %11, %cst_10 : f32
    %13 = arith.index_cast %c0_i32 : i32 to index
    %14 = memref.load %arg5[%13] : memref<5xf32, #tpu.memory_space<smem>>
    memref.store %12, %arg5[%13] : memref<5xf32, #tpu.memory_space<smem>>
    %cst_11 = arith.constant dense<0.000000e+00> : vector<128x128xf32>
    %15 = tpu.matmul %0, %6, %cst_11 {dimension_numbers = #tpu.dot_dimension_numbers<[0], [0], [1], [1], [0, 1, 1, 1], [], []>} : vector<8x128xf32>, vector<8x128xf32>, vector<128x128xf32> -> vector<128x128xf32>
    %cst_12 = arith.constant 1.562500e-02 : f32
    %16 = vector.broadcast %cst_12 : f32 to vector<128x128xf32>
    %17 = arith.mulf %15, %16 : vector<128x128xf32>
    %cst_13 = arith.constant 5.000000e-02 : f32
    %18 = vector.broadcast %cst_13 : f32 to vector<128x128xf32>
    %19 = arith.mulf %18, %17 : vector<128x128xf32>
    %20 = arith.subf %4, %19 : vector<128x128xf32>
    %cst_14 = arith.constant dense<0.000000e+00> : vector<8x128xf32>
    %21 = tpu.matmul %2, %20, %cst_14 {dimension_numbers = #tpu.dot_dimension_numbers<[1], [0], [0], [1], [0, 0, 1, 1], [], []>} : vector<8x128xf32>, vector<128x128xf32>, vector<8x128xf32> -> vector<8x128xf32>
    %22 = arith.subf %21, %3 : vector<8x128xf32>
    %23 = arith.mulf %22, %22 : vector<8x128xf32>
    %24 = vector.shape_cast %23 : vector<8x128xf32> to vector<1x8x128xf32>
    %cst_15 = arith.constant dense<0.000000e+00> : vector<1xf32>
    %25 = vector.multi_reduction <add>, %24, %cst_15 [1, 2] : vector<1x8x128xf32> to vector<1xf32>
    %26 = vector.shape_cast %25 : vector<1xf32> to vector<1x1x1xf32>
    %27 = vector.extract %26[0, 0, 0] : f32 from vector<1x1x1xf32>
    %cst_16 = arith.constant 7.812500e-03 : f32
    %28 = arith.mulf %27, %cst_16 : f32
    %29 = arith.index_cast %c0_i32 : i32 to index
    %30 = memref.load %arg6[%29] : memref<5xf32, #tpu.memory_space<smem>>
    memref.store %28, %arg6[%29] : memref<5xf32, #tpu.memory_space<smem>>
    %c1_i32 = arith.constant 1 : i32
    %cst_17 = arith.constant dense<0.000000e+00> : vector<8x128xf32>
    %31 = tpu.matmul %0, %20, %cst_17 {dimension_numbers = #tpu.dot_dimension_numbers<[1], [0], [0], [1], [0, 0, 1, 1], [], []>} : vector<8x128xf32>, vector<128x128xf32>, vector<8x128xf32> -> vector<8x128xf32>
    %32 = arith.subf %31, %1 : vector<8x128xf32>
    %33 = arith.mulf %32, %32 : vector<8x128xf32>
    %34 = vector.shape_cast %33 : vector<8x128xf32> to vector<1x8x128xf32>
    %cst_18 = arith.constant dense<0.000000e+00> : vector<1xf32>
    %35 = vector.multi_reduction <add>, %34, %cst_18 [1, 2] : vector<1x8x128xf32> to vector<1xf32>
    %36 = vector.shape_cast %35 : vector<1xf32> to vector<1x1x1xf32>
    %37 = vector.extract %36[0, 0, 0] : f32 from vector<1x1x1xf32>
    %cst_19 = arith.constant 7.812500e-03 : f32
    %38 = arith.mulf %37, %cst_19 : f32
    %39 = arith.index_cast %c1_i32 : i32 to index
    %40 = memref.load %arg5[%39] : memref<5xf32, #tpu.memory_space<smem>>
    memref.store %38, %arg5[%39] : memref<5xf32, #tpu.memory_space<smem>>
    %cst_20 = arith.constant dense<0.000000e+00> : vector<128x128xf32>
    %41 = tpu.matmul %0, %32, %cst_20 {dimension_numbers = #tpu.dot_dimension_numbers<[0], [0], [1], [1], [0, 1, 1, 1], [], []>} : vector<8x128xf32>, vector<8x128xf32>, vector<128x128xf32> -> vector<128x128xf32>
    %cst_21 = arith.constant 1.562500e-02 : f32
    %42 = vector.broadcast %cst_21 : f32 to vector<128x128xf32>
    %43 = arith.mulf %41, %42 : vector<128x128xf32>
    %cst_22 = arith.constant 5.000000e-02 : f32
    %44 = vector.broadcast %cst_22 : f32 to vector<128x128xf32>
    %45 = arith.mulf %44, %43 : vector<128x128xf32>
    %46 = arith.subf %20, %45 : vector<128x128xf32>
    %cst_23 = arith.constant dense<0.000000e+00> : vector<8x128xf32>
    %47 = tpu.matmul %2, %46, %cst_23 {dimension_numbers = #tpu.dot_dimension_numbers<[1], [0], [0], [1], [0, 0, 1, 1], [], []>} : vector<8x128xf32>, vector<128x128xf32>, vector<8x128xf32> -> vector<8x128xf32>
    %48 = arith.subf %47, %3 : vector<8x128xf32>
    %49 = arith.mulf %48, %48 : vector<8x128xf32>
    %50 = vector.shape_cast %49 : vector<8x128xf32> to vector<1x8x128xf32>
    %cst_24 = arith.constant dense<0.000000e+00> : vector<1xf32>
    %51 = vector.multi_reduction <add>, %50, %cst_24 [1, 2] : vector<1x8x128xf32> to vector<1xf32>
    %52 = vector.shape_cast %51 : vector<1xf32> to vector<1x1x1xf32>
    %53 = vector.extract %52[0, 0, 0] : f32 from vector<1x1x1xf32>
    %cst_25 = arith.constant 7.812500e-03 : f32
    %54 = arith.mulf %53, %cst_25 : f32
    %55 = arith.index_cast %c1_i32 : i32 to index
    %56 = memref.load %arg6[%55] : memref<5xf32, #tpu.memory_space<smem>>
    memref.store %54, %arg6[%55] : memref<5xf32, #tpu.memory_space<smem>>
    %c2_i32 = arith.constant 2 : i32
    %cst_26 = arith.constant dense<0.000000e+00> : vector<8x128xf32>
    %57 = tpu.matmul %0, %46, %cst_26 {dimension_numbers = #tpu.dot_dimension_numbers<[1], [0], [0], [1], [0, 0, 1, 1], [], []>} : vector<8x128xf32>, vector<128x128xf32>, vector<8x128xf32> -> vector<8x128xf32>
    %58 = arith.subf %57, %1 : vector<8x128xf32>
    %59 = arith.mulf %58, %58 : vector<8x128xf32>
    %60 = vector.shape_cast %59 : vector<8x128xf32> to vector<1x8x128xf32>
    %cst_27 = arith.constant dense<0.000000e+00> : vector<1xf32>
    %61 = vector.multi_reduction <add>, %60, %cst_27 [1, 2] : vector<1x8x128xf32> to vector<1xf32>
    %62 = vector.shape_cast %61 : vector<1xf32> to vector<1x1x1xf32>
    %63 = vector.extract %62[0, 0, 0] : f32 from vector<1x1x1xf32>
    %cst_28 = arith.constant 7.812500e-03 : f32
    %64 = arith.mulf %63, %cst_28 : f32
    %65 = arith.index_cast %c2_i32 : i32 to index
    %66 = memref.load %arg5[%65] : memref<5xf32, #tpu.memory_space<smem>>
    memref.store %64, %arg5[%65] : memref<5xf32, #tpu.memory_space<smem>>
    %cst_29 = arith.constant dense<0.000000e+00> : vector<128x128xf32>
    %67 = tpu.matmul %0, %58, %cst_29 {dimension_numbers = #tpu.dot_dimension_numbers<[0], [0], [1], [1], [0, 1, 1, 1], [], []>} : vector<8x128xf32>, vector<8x128xf32>, vector<128x128xf32> -> vector<128x128xf32>
    %cst_30 = arith.constant 1.562500e-02 : f32
    %68 = vector.broadcast %cst_30 : f32 to vector<128x128xf32>
    %69 = arith.mulf %67, %68 : vector<128x128xf32>
    %cst_31 = arith.constant 5.000000e-02 : f32
    %70 = vector.broadcast %cst_31 : f32 to vector<128x128xf32>
    %71 = arith.mulf %70, %69 : vector<128x128xf32>
    %72 = arith.subf %46, %71 : vector<128x128xf32>
    %cst_32 = arith.constant dense<0.000000e+00> : vector<8x128xf32>
    %73 = tpu.matmul %2, %72, %cst_32 {dimension_numbers = #tpu.dot_dimension_numbers<[1], [0], [0], [1], [0, 0, 1, 1], [], []>} : vector<8x128xf32>, vector<128x128xf32>, vector<8x128xf32> -> vector<8x128xf32>
    %74 = arith.subf %73, %3 : vector<8x128xf32>
    %75 = arith.mulf %74, %74 : vector<8x128xf32>
    %76 = vector.shape_cast %75 : vector<8x128xf32> to vector<1x8x128xf32>
    %cst_33 = arith.constant dense<0.000000e+00> : vector<1xf32>
    %77 = vector.multi_reduction <add>, %76, %cst_33 [1, 2] : vector<1x8x128xf32> to vector<1xf32>
    %78 = vector.shape_cast %77 : vector<1xf32> to vector<1x1x1xf32>
    %79 = vector.extract %78[0, 0, 0] : f32 from vector<1x1x1xf32>
    %cst_34 = arith.constant 7.812500e-03 : f32
    %80 = arith.mulf %79, %cst_34 : f32
    %81 = arith.index_cast %c2_i32 : i32 to index
    %82 = memref.load %arg6[%81] : memref<5xf32, #tpu.memory_space<smem>>
    memref.store %80, %arg6[%81] : memref<5xf32, #tpu.memory_space<smem>>
    %c3_i32 = arith.constant 3 : i32
    %cst_35 = arith.constant dense<0.000000e+00> : vector<8x128xf32>
    %83 = tpu.matmul %0, %72, %cst_35 {dimension_numbers = #tpu.dot_dimension_numbers<[1], [0], [0], [1], [0, 0, 1, 1], [], []>} : vector<8x128xf32>, vector<128x128xf32>, vector<8x128xf32> -> vector<8x128xf32>
    %84 = arith.subf %83, %1 : vector<8x128xf32>
    %85 = arith.mulf %84, %84 : vector<8x128xf32>
    %86 = vector.shape_cast %85 : vector<8x128xf32> to vector<1x8x128xf32>
    %cst_36 = arith.constant dense<0.000000e+00> : vector<1xf32>
    %87 = vector.multi_reduction <add>, %86, %cst_36 [1, 2] : vector<1x8x128xf32> to vector<1xf32>
    %88 = vector.shape_cast %87 : vector<1xf32> to vector<1x1x1xf32>
    %89 = vector.extract %88[0, 0, 0] : f32 from vector<1x1x1xf32>
    %cst_37 = arith.constant 7.812500e-03 : f32
    %90 = arith.mulf %89, %cst_37 : f32
    %91 = arith.index_cast %c3_i32 : i32 to index
    %92 = memref.load %arg5[%91] : memref<5xf32, #tpu.memory_space<smem>>
    memref.store %90, %arg5[%91] : memref<5xf32, #tpu.memory_space<smem>>
    %cst_38 = arith.constant dense<0.000000e+00> : vector<128x128xf32>
    %93 = tpu.matmul %0, %84, %cst_38 {dimension_numbers = #tpu.dot_dimension_numbers<[0], [0], [1], [1], [0, 1, 1, 1], [], []>} : vector<8x128xf32>, vector<8x128xf32>, vector<128x128xf32> -> vector<128x128xf32>
    %cst_39 = arith.constant 1.562500e-02 : f32
    %94 = vector.broadcast %cst_39 : f32 to vector<128x128xf32>
    %95 = arith.mulf %93, %94 : vector<128x128xf32>
    %cst_40 = arith.constant 5.000000e-02 : f32
    %96 = vector.broadcast %cst_40 : f32 to vector<128x128xf32>
    %97 = arith.mulf %96, %95 : vector<128x128xf32>
    %98 = arith.subf %72, %97 : vector<128x128xf32>
    %cst_41 = arith.constant dense<0.000000e+00> : vector<8x128xf32>
    %99 = tpu.matmul %2, %98, %cst_41 {dimension_numbers = #tpu.dot_dimension_numbers<[1], [0], [0], [1], [0, 0, 1, 1], [], []>} : vector<8x128xf32>, vector<128x128xf32>, vector<8x128xf32> -> vector<8x128xf32>
    %100 = arith.subf %99, %3 : vector<8x128xf32>
    %101 = arith.mulf %100, %100 : vector<8x128xf32>
    %102 = vector.shape_cast %101 : vector<8x128xf32> to vector<1x8x128xf32>
    %cst_42 = arith.constant dense<0.000000e+00> : vector<1xf32>
    %103 = vector.multi_reduction <add>, %102, %cst_42 [1, 2] : vector<1x8x128xf32> to vector<1xf32>
    %104 = vector.shape_cast %103 : vector<1xf32> to vector<1x1x1xf32>
    %105 = vector.extract %104[0, 0, 0] : f32 from vector<1x1x1xf32>
    %cst_43 = arith.constant 7.812500e-03 : f32
    %106 = arith.mulf %105, %cst_43 : f32
    %107 = arith.index_cast %c3_i32 : i32 to index
    %108 = memref.load %arg6[%107] : memref<5xf32, #tpu.memory_space<smem>>
    memref.store %106, %arg6[%107] : memref<5xf32, #tpu.memory_space<smem>>
    %c4_i32 = arith.constant 4 : i32
    %cst_44 = arith.constant dense<0.000000e+00> : vector<8x128xf32>
    %109 = tpu.matmul %0, %98, %cst_44 {dimension_numbers = #tpu.dot_dimension_numbers<[1], [0], [0], [1], [0, 0, 1, 1], [], []>} : vector<8x128xf32>, vector<128x128xf32>, vector<8x128xf32> -> vector<8x128xf32>
    %110 = arith.subf %109, %1 : vector<8x128xf32>
    %111 = arith.mulf %110, %110 : vector<8x128xf32>
    %112 = vector.shape_cast %111 : vector<8x128xf32> to vector<1x8x128xf32>
    %cst_45 = arith.constant dense<0.000000e+00> : vector<1xf32>
    %113 = vector.multi_reduction <add>, %112, %cst_45 [1, 2] : vector<1x8x128xf32> to vector<1xf32>
    %114 = vector.shape_cast %113 : vector<1xf32> to vector<1x1x1xf32>
    %115 = vector.extract %114[0, 0, 0] : f32 from vector<1x1x1xf32>
    %cst_46 = arith.constant 7.812500e-03 : f32
    %116 = arith.mulf %115, %cst_46 : f32
    %117 = arith.index_cast %c4_i32 : i32 to index
    %118 = memref.load %arg5[%117] : memref<5xf32, #tpu.memory_space<smem>>
    memref.store %116, %arg5[%117] : memref<5xf32, #tpu.memory_space<smem>>
    %cst_47 = arith.constant dense<0.000000e+00> : vector<128x128xf32>
    %119 = tpu.matmul %0, %110, %cst_47 {dimension_numbers = #tpu.dot_dimension_numbers<[0], [0], [1], [1], [0, 1, 1, 1], [], []>} : vector<8x128xf32>, vector<8x128xf32>, vector<128x128xf32> -> vector<128x128xf32>
    %cst_48 = arith.constant 1.562500e-02 : f32
    %120 = vector.broadcast %cst_48 : f32 to vector<128x128xf32>
    %121 = arith.mulf %119, %120 : vector<128x128xf32>
    %cst_49 = arith.constant 5.000000e-02 : f32
    %122 = vector.broadcast %cst_49 : f32 to vector<128x128xf32>
    %123 = arith.mulf %122, %121 : vector<128x128xf32>
    %124 = arith.subf %98, %123 : vector<128x128xf32>
    %cst_50 = arith.constant dense<0.000000e+00> : vector<8x128xf32>
    %125 = tpu.matmul %2, %124, %cst_50 {dimension_numbers = #tpu.dot_dimension_numbers<[1], [0], [0], [1], [0, 0, 1, 1], [], []>} : vector<8x128xf32>, vector<128x128xf32>, vector<8x128xf32> -> vector<8x128xf32>
    %126 = arith.subf %125, %3 : vector<8x128xf32>
    %127 = arith.mulf %126, %126 : vector<8x128xf32>
    %128 = vector.shape_cast %127 : vector<8x128xf32> to vector<1x8x128xf32>
    %cst_51 = arith.constant dense<0.000000e+00> : vector<1xf32>
    %129 = vector.multi_reduction <add>, %128, %cst_51 [1, 2] : vector<1x8x128xf32> to vector<1xf32>
    %130 = vector.shape_cast %129 : vector<1xf32> to vector<1x1x1xf32>
    %131 = vector.extract %130[0, 0, 0] : f32 from vector<1x1x1xf32>
    %cst_52 = arith.constant 7.812500e-03 : f32
    %132 = arith.mulf %131, %cst_52 : f32
    %133 = arith.index_cast %c4_i32 : i32 to index
    %134 = memref.load %arg6[%133] : memref<5xf32, #tpu.memory_space<smem>>
    memref.store %132, %arg6[%133] : memref<5xf32, #tpu.memory_space<smem>>
    %c5_i32 = arith.constant 5 : i32
    %c0_53 = arith.constant 0 : index
    %c0_54 = arith.constant 0 : index
    %135 = vector.load %arg7[%c0_53, %c0_54] : memref<128x128xf32, #tpu.memory_space<vmem>>, vector<128x128xf32>
    tpu.vector_store %arg7[%c0_53, %c0_54], %124 {strides = array<i32>} : memref<128x128xf32, #tpu.memory_space<vmem>>, vector<128x128xf32>,
    return
  }
}

</mosaic_0001>

<bundles_post_ra>
// kernel: run_training.1
= control target key start
LH: loop header
LB: loop body
LE: loop exit
PB: predicated region body
PF: predicated region fallthrough
CT: control target
= control target key end

     0   :  { %13 = vsyncpa [#allocation3], 0  ;;  %s2035_s0 = inlined_call_operand.vmem [shape: f32[8,128], index: 0, kind: input, shape index: {}]   ;;  %s2036_s1 = inlined_call_operand.vmem [shape: f32[8,128], index: 1, kind: input, shape index: {}]   ;;  %s2037_s2 = inlined_call_operand.vmem [shape: f32[8,128], index: 2, kind: input, shape index: {}]   ;;  %s2038_s3 = inlined_call_operand.vmem [shape: f32[8,128], index: 3, kind: input, shape index: {}]   ;;  %s2039_s4 = inlined_call_operand.vmem [shape: f32[128,128], index: 4, kind: input, shape index: {}]   ;;  %s2040_s5 = inlined_call_operand.hbm [shape: f32[5], index: 5, kind: output, shape index: {0}]   ;;  %s2041_s6 = inlined_call_operand.hbm [shape: f32[5], index: 6, kind: output, shape index: {1}]   ;;  %s2042_s7 = inlined_call_operand.vmem [shape: f32[128,128], index: 7, kind: output, shape index: {2}]  }
   0x1   :  { %v1262_v0 = vld [vmem:[%s2035_s0] sm:$0xff]  ;;  %v1267_v1 = vld [vmem:[%s2039_s4 + $0x78] sm:$0xff]  ;;  %v1272_v2 = vld [vmem:[%s2039_s4 + $0x70] sm:$0xff] }
   0x2   :  { %79 = vxpose.xlu0.b32.start.end [1/1] (short) %v1262_v0, 128  ;;  %45 = vmatpush.msra.mxu0 %v1267_v1  ;;  %v1279_v3 = vld [vmem:[%s2039_s4 + $0x68] sm:$0xff]  ;;  %v1285_v4 = vld [vmem:[%s2039_s4 + $0x60] sm:$0xff]  ;;  %v1291_v5 = vld [vmem:[%s2039_s4 + $0x58] sm:$0xff] }
   0x4   :  { %46 = vmatpush.msra.mxu0 %v1272_v2 }
   0x6   :  { %47 = vmatpush.msra.mxu0 %v1279_v3 }
   0x7   :  { %14 = vsyncpa [#allocation5], 0  ;;  %v1297_v6 = vld [vmem:[%s2039_s4 + $0x50] sm:$0xff]  ;;  %v1303_v7 = vld [vmem:[%s2039_s4 + $0x48] sm:$0xff]  ;;  %vm111_vm0 = vcmask 64512  }
   0x8   :  { %48 = vmatpush.msra.mxu0 %v1285_v4  ;;  %v1309_v8 = vld [vmem:[%s2039_s4 + $0x40] sm:$0xff]  ;;  %v1315_v9 = vld [vmem:[%s2039_s4 + $0x38] sm:$0xff]  ;;  %v1321_v10 = vld [vmem:[%s2039_s4 + $0x30] sm:$0xff] }
   0x9   :  { %v1327_v11 = vld [vmem:[%s2039_s4 + $0x28] sm:$0xff]  ;;  %v1333_v12 = vld [vmem:[%s2039_s4 + $0x20] sm:$0xff]  ;;  %v1339_v13 = vld [vmem:[%s2039_s4 + $0x18] sm:$0xff] }
   0xa   :  { %49 = vmatpush.msra.mxu0 %v1291_v5  ;;  %v1345_v14 = vld [vmem:[%s2039_s4 + $0x10] sm:$0xff]  ;;  %v1351_v15 = vld [vmem:[%s2039_s4 + $0x8] sm:$0xff]  ;;  %v1357_v16 = vld [vmem:[%s2039_s4] sm:$0xff] }
   0xb   :  { %v1365_v17 = vld [vmem:[%s2036_s1] sm:$0xff] }
   0xc   :  { %50 = vmatpush.msra.mxu0 %v1297_v6 }
   0xe   :  { %51 = vmatpush.msra.mxu0 %v1303_v7 }
  0x10   :  { %52 = vmatpush.msra.mxu0 %v1309_v8 }
  0x12   :  { %53 = vmatpush.msra.mxu0 %v1315_v9 }
  0x14   :  { %54 = vmatpush.msra.mxu0 %v1321_v10 }
  0x16   :  { %55 = vmatpush.msra.mxu0 %v1327_v11 }
  0x18   :  { %56 = vmatpush.msra.mxu0 %v1333_v12 }
  0x1a   :  { %57 = vmatpush.msra.mxu0 %v1339_v13 }
  0x1c   :  { %58 = vmatpush.msra.mxu0 %v1345_v14 }
  0x1e   :  { %59 = vmatpush.msra.mxu0 %v1351_v15 }
  0x20   :  { %60 = vmatpush.msra.mxu0 %v1357_v16 }
  0x21   :  { %61 = vmatmul.f32.vlgmr.msra.gmra.mxu0 %v1262_v0 }
  0x9e   :  { %v62_v18 = vpop.f32.mrf.mxu0 }
  0x9f   :  { %v65_v19 = vsub.f32 %v62_v18, %v1365_v17 }
  0xa1   :  { %175 = vmatpush.msrb.mxu0 %v65_v19  ;;  %1160 = vmatpush.msra.mxu1 %v65_v19  ;;  %v66_v29 = vmul.f32 %v65_v19, %v65_v19 }
  0xa6   :  { %v1368_v20 = vpop.trf.xlu0 }
  0xa7   :  { %1080 = vmatmul.msk.f32.vlgmr.msrb.gmra.mxu0 %vm111_vm0, %v1368_v20 }
  0xae   :  { %v1372_v21 = vpop.trf.xlu0 }
  0xaf   :  { %1081 = vmatmul.msk.f32.gmra.mxu0 %vm111_vm0, %v1372_v21 }
  0xb6   :  { %v1376_v22 = vpop.trf.xlu0 }
  0xb7   :  { %1082 = vmatmul.msk.f32.vlgmr.msra.gmra.mxu1 %vm111_vm0, %v1376_v22 }
  0xbe   :  { %v1380_v23 = vpop.trf.xlu0 }
  0xbf   :  { %1083 = vmatmul.msk.f32.gmra.mxu1 %vm111_vm0, %v1380_v23 }
  0xc6   :  { %v1384_v24 = vpop.trf.xlu0 }
  0xc7   :  { %1084 = vmatmul.msk.f32.gmra.mxu1 %vm111_vm0, %v1384_v24 }
  0xce   :  { %v1388_v25 = vpop.trf.xlu0 }
  0xcf   :  { %1085 = vmatmul.msk.f32.gmra.mxu1 %vm111_vm0, %v1388_v25 }
  0xd6   :  { %v1392_v26 = vpop.trf.xlu0 }
  0xd7   :  { %1086 = vmatmul.msk.f32.gmra.mxu1 %vm111_vm0, %v1392_v26 }
  0xde   :  { %v1396_v27 = vpop.trf.xlu0 }
  0xdf   :  { %1087 = vmatmul.msk.f32.gmra.mxu1 %vm111_vm0, %v1396_v27 }
  0xe6   :  { %v1400_v28 = vpop.trf.xlu0 }
  0xe7   :  { %1088 = vmatmul.msk.f32.gmra.mxu1 %vm111_vm0, %v1400_v28 }
  0xeb   :  { %67 = vadd.xlane.f32.xlu0 %v66_v29 }
  0xee   :  { %v1404_v30 = vpop.trf.xlu0 }
  0xef   :  { %1089 = vmatmul.msk.f32.gmra.mxu1 %vm111_vm0, %v1404_v30 }
  0xf6   :  { %v1408_v31 = vpop.trf.xlu0 }
  0xf7   :  { %1090 = vmatmul.msk.f32.gmra.mxu1 %vm111_vm0, %v1408_v31 }
  0xfe   :  { %v1412_v32 = vpop.trf.xlu0 }
  0xff   :  { %1091 = vmatmul.msk.f32.gmra.mxu1 %vm111_vm0, %v1412_v32 }
 0x106   :  { %v1416_v33 = vpop.trf.xlu0 }
 0x107   :  { %1092 = vmatmul.msk.f32.gmra.mxu1 %vm111_vm0, %v1416_v33 }
 0x10e   :  { %v1420_v34 = vpop.trf.xlu0 }
 0x10f   :  { %1093 = vmatmul.msk.f32.gmra.mxu1 %vm111_vm0, %v1420_v34 }
 0x116   :  { %v1424_v35 = vpop.trf.xlu0 }
 0x117   :  { %1094 = vmatmul.msk.f32.gmra.mxu1 %vm111_vm0, %v1424_v35 }
 0x11e   :  { %v1428_v36 = vpop.trf.xlu0 }
 0x11f   :  { %2045 = vst [vmem:[#allocation8_spill] sm:$0xff] %v1428_v36  ;;  %1095 = vmatmul.msk.f32.gmra.mxu1 %vm111_vm0, %v1428_v36 }
 0x134   :  { %v1432_v37 = vpop.f32.mrf.mxu1 }
 0x13c   :  { %v1434_v38 = vpop.f32.mrf.mxu1 }
 0x144   :  { %v189_v39 = vpop.f32.mrf.mxu1 }
 0x14c   :  { %v192_v40 = vpop.f32.mrf.mxu1 }
 0x154   :  { %v195_v41 = vpop.f32.mrf.mxu1 }
 0x15c   :  { %v198_v42 = vpop.f32.mrf.mxu1 }
 0x15e   :  { %v68_v43 = vpop.xlane.xlu0 %67 }
 0x15f   :  { %v69_v44 = vrot.slane %v68_v43, 4 }
 0x161   :  { %v70_v45 = vadd.f32 %v69_v44, %v68_v43 }
 0x163   :  { %v71_v46 = vrot.slane %v70_v45, 2 }
 0x164   :  { %v201_v47 = vpop.f32.mrf.mxu1 }
 0x165   :  { %v72_v48 = vadd.f32 %v71_v46, %v70_v45 }
 0x167   :  { %v73_v49 = vrot.slane %v72_v48, 1 }
 0x169   :  { %v74_v50 = vadd.f32 %v73_v49, %v72_v48 }
 0x16b   :  { %1162 = vpush %v74_v50 }
 0x16c   :  { %v204_v51 = vpop.f32.mrf.mxu1 }
 0x16d   :  { %v234_v46 = vmul.f32 0.015625, %v204_v51 }
 0x16f   :  { %v250_v51 = vmul.f32 0.05, %v234_v46 }
 0x174   :  { %v207_v52 = vpop.f32.mrf.mxu1 }
 0x175   :  { %v235_v43 = vmul.f32 0.015625, %v207_v52 }
 0x177   :  { %v251_v50 = vmul.f32 0.05, %v235_v43 }
 0x17c   :  { %v210_v53 = vpop.f32.mrf.mxu1 }
 0x17d   :  { %v236_v18 = vmul.f32 0.015625, %v210_v53  ;;  %v232_v53 = vmul.f32 0.015625, %v198_v42  ;;  %v1465_v42 = vsub.f32 %v1303_v7, %v250_v51 }
 0x17f   :  { %v252_v48 = vmul.f32 0.05, %v236_v18 }
 0x184   :  { %v213_v54 = vpop.f32.mrf.mxu1 }
 0x185   :  { %v237_v61 = vmul.f32 0.015625, %v213_v54  ;;  %v1455_v54 = vsub.f32 %v1291_v5, %v252_v48  ;;  %v229_v5 = vmul.f32 0.015625, %v189_v39  ;;  %v227_v39 = vmul.f32 0.015625, %v1432_v37 }
 0x187   :  { %v253_v44 = vmul.f32 0.05, %v237_v61 }
 0x189   :  { %v1450_v52 = vsub.f32 %v1285_v4, %v253_v44  ;;  %v230_v4 = vmul.f32 0.015625, %v192_v40 }
 0x18b   :  { %v246_v40 = vmul.f32 0.05, %v230_v4 }
 0x18c   :  { %v216_v55 = vpop.f32.mrf.mxu1 }
 0x18d   :  { %v238_v59 = vmul.f32 0.015625, %v216_v55  ;;  %v1460_v55 = vsub.f32 %v1297_v6, %v251_v50  ;;  %v228_v6 = vmul.f32 0.015625, %v1434_v38 }
 0x18f   :  { %v254_v19 = vmul.f32 0.05, %v238_v59  ;;  %v245_v59 = vmul.f32 0.05, %v229_v5 }
 0x191   :  { %v1445_v49 = vsub.f32 %v1279_v3, %v254_v19  ;;  %v231_v3 = vmul.f32 0.015625, %v195_v41  ;;  %v1494_v37 = vsub.f32 %v1333_v12, %v245_v59 }
 0x194   :  { %v219_v56 = vpop.f32.mrf.mxu1 }
 0x195   :  { %v239_v57 = vmul.f32 0.015625, %v219_v56  ;;  %v248_v56 = vmul.f32 0.05, %v232_v53 }
 0x197   :  { %v255_v62 = vmul.f32 0.05, %v239_v57  ;;  %v247_v57 = vmul.f32 0.05, %v231_v3  ;;  %v1478_v7 = vsub.f32 %v1315_v9, %v248_v56  ;;  %v1489_v9 = vsub.f32 %v1327_v11, %v246_v40 }
 0x199   :  { %v1440_v45 = vsub.f32 %v1272_v2, %v255_v62  ;;  %v177_v2 = vpop.f32.mrf.mxu0  ;;  %v243_v62 = vmul.f32 0.05, %v227_v39 }
 0x19a   :  { %v225_v61 = vmul.f32 0.015625, %v177_v2 }
 0x19b   :  { %v1504_v11 = vsub.f32 %v1345_v14, %v243_v62  ;;  %v1528_v14 = vld [vmem:[%s2038_s3] sm:$0xff] }
 0x19c   :  { %s1163_s4 = spop %1162  ;;  %v222_v58 = vpop.f32.mrf.mxu1  ;;  %v241_v18 = vmul.f32 0.05, %v225_v61 }
 0x19d   :  { %s76_s14 = smul.f32 0.0078125, %s1163_s4  ;;  %v240_v60 = vmul.f32 0.015625, %v222_v58 }
 0x19e   :  { %v1512_v12 = vsub.f32 %v1357_v16, %v241_v18 }
 0x19f   :  { %78 = sst [smem:[#allocation2]] %s76_s14  ;;  %v256_v63 = vmul.f32 0.05, %v240_v60  ;;  %v244_v60 = vmul.f32 0.05, %v228_v6 }
 0x1a1   :  { %v1437_v29 = vsub.f32 %v1267_v1, %v256_v63  ;;  %v233_v1 = vmul.f32 0.015625, %v201_v47  ;;  %v180_v58 = vpop.f32.mrf.mxu0  ;;  %v1499_v63 = vsub.f32 %v1339_v13, %v244_v60  ;;  %v1519_v13 = vld [vmem:[%s2037_s2] sm:$0xff] }
 0x1a2   :  { %v226_v38 = vmul.f32 0.015625, %v180_v58 }
 0x1a3   :  { %273 = vmatpush.msra.mxu0 %v1437_v29  ;;  %307 = vmatpush.msra.mxu3 %v1437_v29  ;;  %v249_v47 = vmul.f32 0.05, %v233_v1 }
 0x1a5   :  { %274 = vmatpush.msra.mxu0 %v1440_v45  ;;  %308 = vmatpush.msra.mxu3 %v1440_v45  ;;  %v1470_v41 = vsub.f32 %v1309_v8, %v249_v47  ;;  %v1484_v8 = vsub.f32 %v1321_v10, %v247_v57  ;;  %v242_v10 = vmul.f32 0.05, %v226_v38 }
 0x1a7   :  { %275 = vmatpush.msra.mxu0 %v1445_v49  ;;  %309 = vmatpush.msra.mxu3 %v1445_v49  ;;  %v1507_v19 = vsub.f32 %v1351_v15, %v242_v10 }
 0x1a9   :  { %276 = vmatpush.msra.mxu0 %v1450_v52  ;;  %310 = vmatpush.msra.mxu3 %v1450_v52 }
 0x1ab   :  { %277 = vmatpush.msra.mxu0 %v1455_v54  ;;  %311 = vmatpush.msra.mxu3 %v1455_v54 }
 0x1ad   :  { %278 = vmatpush.msra.mxu0 %v1460_v55  ;;  %312 = vmatpush.msra.mxu3 %v1460_v55 }
 0x1af   :  { %279 = vmatpush.msra.mxu0 %v1465_v42  ;;  %313 = vmatpush.msra.mxu3 %v1465_v42 }
 0x1b1   :  { %280 = vmatpush.msra.mxu0 %v1470_v41  ;;  %314 = vmatpush.msra.mxu3 %v1470_v41 }
 0x1b3   :  { %281 = vmatpush.msra.mxu0 %v1478_v7  ;;  %315 = vmatpush.msra.mxu3 %v1478_v7 }
 0x1b5   :  { %282 = vmatpush.msra.mxu0 %v1484_v8  ;;  %316 = vmatpush.msra.mxu3 %v1484_v8 }
 0x1b7   :  { %283 = vmatpush.msra.mxu0 %v1489_v9  ;;  %317 = vmatpush.msra.mxu3 %v1489_v9 }
 0x1b9   :  { %284 = vmatpush.msra.mxu0 %v1494_v37  ;;  %318 = vmatpush.msra.mxu3 %v1494_v37 }
 0x1bb   :  { %285 = vmatpush.msra.mxu0 %v1499_v63  ;;  %319 = vmatpush.msra.mxu3 %v1499_v63 }
 0x1bd   :  { %286 = vmatpush.msra.mxu0 %v1504_v11  ;;  %320 = vmatpush.msra.mxu3 %v1504_v11 }
 0x1bf   :  { %287 = vmatpush.msra.mxu0 %v1507_v19  ;;  %321 = vmatpush.msra.mxu3 %v1507_v19 }
 0x1c1   :  { %288 = vmatpush.msra.mxu0 %v1512_v12  ;;  %322 = vmatpush.msra.mxu3 %v1512_v12 }
 0x1c2   :  { %289 = vmatmul.f32.vlgmr.msra.gmra.mxu0 %v1519_v13  ;;  %323 = vmatmul.f32.vlgmr.msra.gmra.mxu3 %v1262_v0 }
 0x23f   :  { %v290_v15 = vpop.f32.mrf.mxu0 }
 0x240   :  { %v293_v16 = vsub.f32 %v290_v15, %v1528_v14 }
 0x242   :  { %v294_v43 = vmul.f32 %v293_v16, %v293_v16 }
 0x244   :  { %295 = vadd.xlane.f32.xlu1 %v294_v43 }
 0x245   :  { %v324_v44 = vpop.f32.mrf.mxu3 }
 0x246   :  { %v327_v46 = vsub.f32 %v324_v44, %v1365_v17 }
 0x248   :  { %356 = vmatpush.msrb.mxu0 %v327_v46  ;;  %v328_v48 = vmul.f32 %v327_v46, %v327_v46 }
 0x249   :  { %1096 = vmatmul.msk.f32.vlgmr.msrb.gmra.mxu0 %vm111_vm0, %v1368_v20 }
 0x24c   :  { %329 = vadd.xlane.f32.xlu1 %v328_v48 }
 0x251   :  { %1097 = vmatmul.msk.f32.gmra.mxu0 %vm111_vm0, %v1372_v21 }
 0x259   :  { %1098 = vmatmul.msk.f32.gmra.mxu0 %vm111_vm0, %v1376_v22 }
 0x261   :  { %1099 = vmatmul.msk.f32.gmra.mxu0 %vm111_vm0, %v1380_v23 }
 0x269   :  { %1100 = vmatmul.msk.f32.gmra.mxu0 %vm111_vm0, %v1384_v24 }
 0x271   :  { %1101 = vmatmul.msk.f32.gmra.mxu0 %vm111_vm0, %v1388_v25 }
 0x279   :  { %1102 = vmatmul.msk.f32.gmra.mxu0 %vm111_vm0, %v1392_v26 }
 0x281   :  { %1103 = vmatmul.msk.f32.gmra.mxu0 %vm111_vm0, %v1396_v27 }
 0x289   :  { %1104 = vmatmul.msk.f32.gmra.mxu0 %vm111_vm0, %v1400_v28 }
 0x291   :  { %1105 = vmatmul.msk.f32.gmra.mxu0 %vm111_vm0, %v1404_v30 }
 0x299   :  { %1106 = vmatmul.msk.f32.gmra.mxu0 %vm111_vm0, %v1408_v31 }
 0x2a1   :  { %1107 = vmatmul.msk.f32.gmra.mxu0 %vm111_vm0, %v1412_v32 }
 0x2a9   :  { %1108 = vmatmul.msk.f32.gmra.mxu0 %vm111_vm0, %v1416_v33 }
 0x2b1   :  { %1109 = vmatmul.msk.f32.gmra.mxu0 %vm111_vm0, %v1420_v34 }
 0x2b7   :  { %v296_v1 = vpop.xlane.xlu1 %295 }
 0x2b8   :  { %v297_v50 = vrot.slane %v296_v1, 4 }
 0x2b9   :  { %1110 = vmatmul.msk.f32.gmra.mxu0 %vm111_vm0, %v1424_v35 }
 0x2ba   :  { %v298_v2 = vadd.f32 %v297_v50, %v296_v1 }
 0x2bc   :  { %v299_v53 = vrot.slane %v298_v2, 2 }
 0x2be   :  { %v300_v51 = vadd.f32 %v299_v53, %v298_v2 }
 0x2bf   :  { %v330_v3 = vpop.xlane.xlu1 %329 }
 0x2c0   :  { %v331_v47 = vrot.slane %v330_v3, 4  ;;  %v301_v4 = vrot.slane %v300_v51, 1 }
 0x2c1   :  { %1111 = vmatmul.msk.f32.gmra.mxu0 %vm111_vm0, %v1428_v36 }
 0x2c2   :  { %v332_v56 = vadd.f32 %v331_v47, %v330_v3  ;;  %v302_v5 = vadd.f32 %v301_v4, %v300_v51 }
 0x2c4   :  { %v333_v57 = vrot.slane %v332_v56, 2  ;;  %1164 = vpush %v302_v5 }
 0x2c6   :  { %v1564_v6 = vpop.f32.mrf.mxu0  ;;  %v334_v40 = vadd.f32 %v333_v57, %v332_v56 }
 0x2c8   :  { %v335_v58 = vrot.slane %v334_v40, 1 }
 0x2ca   :  { %v336_v39 = vadd.f32 %v335_v58, %v334_v40 }
 0x2cc   :  { %1166 = vpush %v336_v39 }
 0x2ce   :  { %v1566_v59 = vpop.f32.mrf.mxu0 }
 0x2d6   :  { %v1568_v38 = vpop.f32.mrf.mxu0 }
 0x2de   :  { %v367_v60 = vpop.f32.mrf.mxu0 }
 0x2e6   :  { %v370_v61 = vpop.f32.mrf.mxu0 }
 0x2ee   :  { %v373_v62 = vpop.f32.mrf.mxu0 }
 0x2f5   :  { %s1165_s19 = spop %1164 }
 0x2f6   :  { %v376_v10 = vpop.f32.mrf.mxu0  ;;  %s304_s20 = smul.f32 0.0078125, %s1165_s19 }
 0x2f8   :  { %306 = sst [smem:[#allocation4]] %s304_s20 }
 0x2fd   :  { %s1167_s21 = spop %1166 }
 0x2fe   :  { %s338_s22 = smul.f32 0.0078125, %s1167_s21  ;;  %v379_v18 = vpop.f32.mrf.mxu0 }
 0x300   :  { %340 = sst [smem:[#allocation2 + $0x1]] %s338_s22 }
 0x306   :  { %v382_v15 = vpop.f32.mrf.mxu0 }
 0x30e   :  { %v385_v16 = vpop.f32.mrf.mxu0 }
 0x316   :  { %v388_v43 = vpop.f32.mrf.mxu0 }
 0x317   :  { %v416_v40 = vmul.f32 0.015625, %v388_v43 }
 0x31e   :  { %v391_v44 = vpop.f32.mrf.mxu0 }
 0x31f   :  { %v417_v56 = vmul.f32 0.015625, %v391_v44  ;;  %v432_v44 = vmul.f32 0.05, %v416_v40 }
 0x326   :  { %v394_v46 = vpop.f32.mrf.mxu0 }
 0x327   :  { %v418_v3 = vmul.f32 0.015625, %v394_v46 }
 0x329   :  { %v434_v58 = vmul.f32 0.05, %v418_v3 }
 0x32b   :  { %v1584_v43 = vsub.f32 %v1450_v52, %v434_v58  ;;  %v411_v52 = vmul.f32 0.015625, %v373_v62 }
 0x32d   :  { %v427_v3 = vmul.f32 0.05, %v411_v52 }
 0x32e   :  { %v397_v48 = vpop.f32.mrf.mxu0 }
 0x32f   :  { %v419_v53 = vmul.f32 0.015625, %v397_v48  ;;  %v433_v48 = vmul.f32 0.05, %v417_v56 }
 0x331   :  { %v435_v5 = vmul.f32 0.05, %v419_v53 }
 0x333   :  { %v1579_v46 = vsub.f32 %v1445_v49, %v435_v5  ;;  %v412_v49 = vmul.f32 0.015625, %v376_v10 }
 0x336   :  { %v400_v1 = vpop.f32.mrf.mxu0 }
 0x337   :  { %v420_v50 = vmul.f32 0.015625, %v400_v1  ;;  %v415_v1 = vmul.f32 0.015625, %v385_v16  ;;  %v1589_v16 = vsub.f32 %v1455_v54, %v433_v48  ;;  %v410_v54 = vmul.f32 0.015625, %v370_v61 }
 0x339   :  { %v436_v47 = vmul.f32 0.05, %v420_v50  ;;  %v431_v50 = vmul.f32 0.05, %v415_v1  ;;  %v426_v61 = vmul.f32 0.05, %v410_v54 }
 0x33b   :  { %v1574_v39 = vsub.f32 %v1440_v45, %v436_v47  ;;  %v413_v45 = vmul.f32 0.015625, %v379_v18  ;;  %v1599_v18 = vsub.f32 %v1465_v42, %v431_v50  ;;  %v408_v42 = vmul.f32 0.015625, %v1568_v38 }
 0x33c   :  { %v406_v38 = vmul.f32 0.015625, %v1564_v6 }
 0x33d   :  { %v429_v53 = vmul.f32 0.05, %v413_v45 }
 0x33e   :  { %v403_v2 = vpop.f32.mrf.mxu0 }
 0x33f   :  { %v421_v51 = vmul.f32 0.015625, %v403_v2  ;;  %v1609_v62 = vsub.f32 %v1478_v7, %v429_v53  ;;  %v1621_v7 = vsub.f32 %v1489_v9, %v427_v3  ;;  %v422_v9 = vmul.f32 0.05, %v406_v38 }
 0x341   :  { %v437_v4 = vmul.f32 0.05, %v421_v51  ;;  %v428_v51 = vmul.f32 0.05, %v412_v49 }
 0x343   :  { %v1571_v57 = vsub.f32 %v1437_v29, %v437_v4  ;;  %v414_v29 = vmul.f32 0.015625, %v382_v15  ;;  %v1594_v15 = vsub.f32 %v1460_v55, %v432_v44  ;;  %v409_v55 = vmul.f32 0.015625, %v367_v60 }
 0x344   :  { %v1615_v47 = vsub.f32 %v1484_v8, %v428_v51  ;;  %v424_v4 = vmul.f32 0.05, %v408_v42  ;;  %v1627_v8 = vsub.f32 %v1494_v37, %v426_v61 }
 0x345   :  { %454 = vmatpush.msra.mxu2 %v1571_v57  ;;  %488 = vmatpush.msrb.mxu3 %v1571_v57  ;;  %v430_v2 = vmul.f32 0.05, %v414_v29  ;;  %v425_v60 = vmul.f32 0.05, %v409_v55 }
 0x346   :  { %v1637_v5 = vsub.f32 %v1504_v11, %v424_v4 }
 0x347   :  { %455 = vmatpush.msra.mxu2 %v1574_v39  ;;  %489 = vmatpush.msrb.mxu3 %v1574_v39  ;;  %v1604_v10 = vsub.f32 %v1470_v41, %v430_v2  ;;  %v407_v41 = vmul.f32 0.015625, %v1566_v59  ;;  %v1632_v59 = vsub.f32 %v1499_v63, %v425_v60  ;;  %v1647_v63 = vsub.f32 %v1512_v12, %v422_v9 }
 0x349   :  { %456 = vmatpush.msra.mxu2 %v1579_v46  ;;  %490 = vmatpush.msrb.mxu3 %v1579_v46  ;;  %v423_v56 = vmul.f32 0.05, %v407_v41 }
 0x34b   :  { %457 = vmatpush.msra.mxu2 %v1584_v43  ;;  %491 = vmatpush.msrb.mxu3 %v1584_v43  ;;  %v1642_v37 = vsub.f32 %v1507_v19, %v423_v56 }
 0x34d   :  { %458 = vmatpush.msra.mxu2 %v1589_v16  ;;  %492 = vmatpush.msrb.mxu3 %v1589_v16 }
 0x34f   :  { %459 = vmatpush.msra.mxu2 %v1594_v15  ;;  %493 = vmatpush.msrb.mxu3 %v1594_v15 }
 0x351   :  { %460 = vmatpush.msra.mxu2 %v1599_v18  ;;  %494 = vmatpush.msrb.mxu3 %v1599_v18 }
 0x353   :  { %461 = vmatpush.msra.mxu2 %v1604_v10  ;;  %495 = vmatpush.msrb.mxu3 %v1604_v10 }
 0x355   :  { %462 = vmatpush.msra.mxu2 %v1609_v62  ;;  %496 = vmatpush.msrb.mxu3 %v1609_v62 }
 0x357   :  { %463 = vmatpush.msra.mxu2 %v1615_v47  ;;  %497 = vmatpush.msrb.mxu3 %v1615_v47 }
 0x359   :  { %464 = vmatpush.msra.mxu2 %v1621_v7  ;;  %498 = vmatpush.msrb.mxu3 %v1621_v7 }
 0x35b   :  { %465 = vmatpush.msra.mxu2 %v1627_v8  ;;  %499 = vmatpush.msrb.mxu3 %v1627_v8 }
 0x35d   :  { %466 = vmatpush.msra.mxu2 %v1632_v59  ;;  %500 = vmatpush.msrb.mxu3 %v1632_v59 }
 0x35f   :  { %467 = vmatpush.msra.mxu2 %v1637_v5  ;;  %501 = vmatpush.msrb.mxu3 %v1637_v5 }
 0x361   :  { %468 = vmatpush.msra.mxu2 %v1642_v37  ;;  %502 = vmatpush.msrb.mxu3 %v1642_v37 }
 0x363   :  { %469 = vmatpush.msra.mxu2 %v1647_v63  ;;  %503 = vmatpush.msrb.mxu3 %v1647_v63 }
 0x364   :  { %470 = vmatmul.f32.vlgmr.msra.gmra.mxu2 %v1519_v13  ;;  %504 = vmatmul.f32.vlgmr.msrb.gmra.mxu3 %v1262_v0 }
 0x3e7   :  { %v471_v11 = vpop.f32.mrf.mxu2  ;;  %v505_v19 = vpop.f32.mrf.mxu3 }
 0x3e8   :  { %v508_v6 = vsub.f32 %v505_v19, %v1365_v17  ;;  %v474_v40 = vsub.f32 %v471_v11, %v1528_v14 }
 0x3ea   :  { %537 = vmatpush.msrb.mxu2 %v508_v6  ;;  %v475_v12 = vmul.f32 %v474_v40, %v474_v40  ;;  %v509_v58 = vmul.f32 %v508_v6, %v508_v6 }
 0x3eb   :  { %1112 = vmatmul.msk.f32.vlgmr.msrb.gmra.mxu2 %vm111_vm0, %v1368_v20 }
 0x3ec   :  { %476 = vadd.xlane.f32.xlu2 %v475_v12 }
 0x3f3   :  { %1113 = vmatmul.msk.f32.gmra.mxu2 %vm111_vm0, %v1372_v21 }
 0x3f4   :  { %510 = vadd.xlane.f32.xlu2 %v509_v58 }
 0x3fb   :  { %1114 = vmatmul.msk.f32.gmra.mxu2 %vm111_vm0, %v1376_v22 }
 0x403   :  { %1115 = vmatmul.msk.f32.gmra.mxu2 %vm111_vm0, %v1380_v23 }
 0x40b   :  { %1116 = vmatmul.msk.f32.gmra.mxu2 %vm111_vm0, %v1384_v24 }
 0x413   :  { %1117 = vmatmul.msk.f32.gmra.mxu2 %vm111_vm0, %v1388_v25 }
 0x41b   :  { %1118 = vmatmul.msk.f32.gmra.mxu2 %vm111_vm0, %v1392_v26 }
 0x423   :  { %1119 = vmatmul.msk.f32.gmra.mxu2 %vm111_vm0, %v1396_v27 }
 0x42b   :  { %1120 = vmatmul.msk.f32.gmra.mxu2 %vm111_vm0, %v1400_v28 }
 0x433   :  { %1121 = vmatmul.msk.f32.gmra.mxu2 %vm111_vm0, %v1404_v30 }
 0x43b   :  { %1122 = vmatmul.msk.f32.gmra.mxu2 %vm111_vm0, %v1408_v31 }
 0x443   :  { %1123 = vmatmul.msk.f32.gmra.mxu2 %vm111_vm0, %v1412_v32 }
 0x44b   :  { %1124 = vmatmul.msk.f32.gmra.mxu2 %vm111_vm0, %v1416_v33 }
 0x453   :  { %1125 = vmatmul.msk.f32.gmra.mxu2 %vm111_vm0, %v1420_v34 }
 0x45b   :  { %1126 = vmatmul.msk.f32.gmra.mxu2 %vm111_vm0, %v1424_v35 }
 0x45f   :  { %v477_v1 = vpop.xlane.xlu2 %476 }
 0x460   :  { %v478_v48 = vrot.slane %v477_v1, 4 }
 0x462   :  { %v479_v29 = vadd.f32 %v478_v48, %v477_v1 }
 0x463   :  { %1127 = vmatmul.msk.f32.gmra.mxu2 %vm111_vm0, %v1428_v36 }
 0x464   :  { %v480_v44 = vrot.slane %v479_v29, 2 }
 0x466   :  { %v481_v45 = vadd.f32 %v480_v44, %v479_v29 }
 0x467   :  { %v511_v50 = vpop.xlane.xlu2 %510 }
 0x468   :  { %v512_v49 = vrot.slane %v511_v50, 4  ;;  %v482_v2 = vrot.slane %v481_v45, 1 }
 0x46a   :  { %v513_v52 = vadd.f32 %v512_v49, %v511_v50  ;;  %v483_v53 = vadd.f32 %v482_v2, %v481_v45 }
 0x46c   :  { %v514_v54 = vrot.slane %v513_v52, 2  ;;  %1168 = vpush %v483_v53 }
 0x46e   :  { %v1689_v51 = vpop.f32.mrf.mxu2  ;;  %v515_v55 = vadd.f32 %v514_v54, %v513_v52 }
 0x470   :  { %v516_v3 = vrot.slane %v515_v55, 1 }
 0x472   :  { %v517_v42 = vadd.f32 %v516_v3, %v515_v55 }
 0x474   :  { %1170 = vpush %v517_v42 }
 0x476   :  { %v1691_v61 = vpop.f32.mrf.mxu2 }
 0x47e   :  { %v545_v41 = vpop.f32.mrf.mxu2 }
 0x486   :  { %v548_v60 = vpop.f32.mrf.mxu2 }
 0x48e   :  { %v551_v38 = vpop.f32.mrf.mxu2 }
 0x496   :  { %v554_v4 = vpop.f32.mrf.mxu2 }
 0x49d   :  { %s1169_s23 = spop %1168 }
 0x49e   :  { %v557_v56 = vpop.f32.mrf.mxu2  ;;  %s485_s24 = smul.f32 0.0078125, %s1169_s23 }
 0x4a0   :  { %487 = sst [smem:[#allocation4 + $0x1]] %s485_s24  ;;  %s1052_s24 = sshll.u32 %s2040_s5, 4  ;;  %s1053_s24 = int_to_ptr.hbm [resolvable:$true] %s1052_s24 }
 0x4a1   :  { %s1218_s5 = smov [#allocation4]  }
 0x4a5   :  { %s1171_s25 = spop %1170 }
 0x4a6   :  { %s519_s26 = smul.f32 0.0078125, %s1171_s25  ;;  %v560_v9 = vpop.f32.mrf.mxu2  ;;  %s1217_s25 = smov [#allocation2]  }
 0x4a8   :  { %521 = sst [smem:[#allocation2 + $0x2]] %s519_s26  ;;  %s1061_s26 = sshll.u32 %s2041_s6, 4  ;;  %s1062_s26 = int_to_ptr.hbm [resolvable:$true] %s1061_s26 }
 0x4ae   :  { %v563_v11 = vpop.f32.mrf.mxu2 }
 0x4b6   :  { %v566_v19 = vpop.f32.mrf.mxu2 }
 0x4b7   :  { %v596_v36 = vmul.f32 0.015625, %v566_v19  ;;  %v593_v19 = vmul.f32 0.015625, %v557_v56  ;;  %v590_v56 = vmul.f32 0.015625, %v548_v60 }
 0x4be   :  { %v569_v6 = vpop.f32.mrf.mxu2 }
 0x4bf   :  { %v597_v55 = vmul.f32 0.015625, %v569_v6  ;;  %v612_v6 = vmul.f32 0.05, %v596_v36  ;;  %v591_v36 = vmul.f32 0.015625, %v551_v38  ;;  %v588_v38 = vmul.f32 0.015625, %v1691_v61 }
 0x4c6   :  { %v572_v40 = vpop.f32.mrf.mxu2 }
 0x4c7   :  { %v598_v52 = vmul.f32 0.015625, %v572_v40  ;;  %v613_v40 = vmul.f32 0.05, %v597_v55 }
 0x4ce   :  { %v575_v12 = vpop.f32.mrf.mxu2 }
 0x4cf   :  { %v599_v50 = vmul.f32 0.015625, %v575_v12  ;;  %v595_v12 = vmul.f32 0.015625, %v563_v11  ;;  %v592_v11 = vmul.f32 0.015625, %v554_v4  ;;  %v589_v4 = vmul.f32 0.015625, %v545_v41 }
 0x4d1   :  { %v615_v3 = vmul.f32 0.05, %v599_v50  ;;  %v607_v50 = vmul.f32 0.05, %v591_v36  ;;  %v605_v60 = vmul.f32 0.05, %v589_v4 }
 0x4d6   :  { %v578_v58 = vpop.f32.mrf.mxu2 }
 0x4d7   :  { %v600_v44 = vmul.f32 0.015625, %v578_v58 }
 0x4d9   :  { %v616_v53 = vmul.f32 0.05, %v600_v44 }
 0x4db   :  { %v1701_v58 = vsub.f32 %v1579_v46, %v616_v53  ;;  %v1713_v46 = vsub.f32 %v1594_v15, %v613_v40 }
 0x4de   :  { %v581_v1 = vpop.f32.mrf.mxu2 }
 0x4df   :  { %v601_v48 = vmul.f32 0.015625, %v581_v1  ;;  %v614_v1 = vmul.f32 0.05, %v598_v52 }
 0x4e1   :  { %v617_v49 = vmul.f32 0.05, %v601_v48  ;;  %v1705_v48 = vsub.f32 %v1584_v43, %v615_v3  ;;  %v1717_v43 = vsub.f32 %v1599_v18, %v612_v6 }
 0x4e3   :  { %v1697_v42 = vsub.f32 %v1574_v39, %v617_v49  ;;  %v1709_v39 = vsub.f32 %v1589_v16, %v614_v1 }
 0x4e6   :  { %v584_v29 = vpop.f32.mrf.mxu2 }
 0x4e7   :  { %v602_v45 = vmul.f32 0.015625, %v584_v29  ;;  %v611_v29 = vmul.f32 0.05, %v595_v12 }
 0x4e9   :  { %v618_v2 = vmul.f32 0.05, %v602_v45  ;;  %v1721_v16 = vsub.f32 %v1604_v10, %v611_v29  ;;  %v608_v45 = vmul.f32 0.05, %v592_v11  ;;  %v606_v10 = vmul.f32 0.05, %v590_v56 }
 0x4ea   :  { %v2046_v29 = vld [vmem:[#allocation8_spill] sm:$0xff] }
 0x4eb   :  { %v1694_v54 = vsub.f32 %v1571_v57, %v618_v2  ;;  %v594_v57 = vmul.f32 0.015625, %v560_v9  ;;  %v609_v9 = vmul.f32 0.05, %v593_v19  ;;  %v1734_v49 = vsub.f32 %v1621_v7, %v608_v45 }
 0x4ec   :  { %v1739_v2 = vsub.f32 %v1627_v8, %v607_v50  ;;  %v1743_v41 = vsub.f32 %v1632_v59, %v606_v10  ;;  %v1747_v7 = vsub.f32 %v1637_v5, %v605_v60 }
 0x4ed   :  { %635 = vmatpush.msra.mxu3 %v1694_v54  ;;  %v610_v44 = vmul.f32 0.05, %v594_v57  ;;  %v1729_v18 = vsub.f32 %v1615_v47, %v609_v9  ;;  %v604_v47 = vmul.f32 0.05, %v588_v38 }
 0x4ef   :  { %636 = vmatpush.msra.mxu3 %v1697_v42  ;;  %v1725_v15 = vsub.f32 %v1609_v62, %v610_v44  ;;  %v587_v62 = vmul.f32 0.015625, %v1689_v51  ;;  %v1751_v51 = vsub.f32 %v1642_v37, %v604_v47 }
 0x4f1   :  { %637 = vmatpush.msra.mxu3 %v1701_v58  ;;  %v603_v61 = vmul.f32 0.05, %v587_v62 }
 0x4f3   :  { %638 = vmatpush.msra.mxu3 %v1705_v48  ;;  %v1755_v8 = vsub.f32 %v1647_v63, %v603_v61 }
 0x4f5   :  { %639 = vmatpush.msra.mxu3 %v1709_v39 }
 0x4f7   :  { %640 = vmatpush.msra.mxu3 %v1713_v46 }
 0x4f9   :  { %641 = vmatpush.msra.mxu3 %v1717_v43 }
 0x4fb   :  { %642 = vmatpush.msra.mxu3 %v1721_v16 }
 0x4fd   :  { %643 = vmatpush.msra.mxu3 %v1725_v15 }
 0x4ff   :  { %644 = vmatpush.msra.mxu3 %v1729_v18 }
 0x501   :  { %645 = vmatpush.msra.mxu3 %v1734_v49 }
 0x503   :  { %646 = vmatpush.msra.mxu3 %v1739_v2 }
 0x505   :  { %647 = vmatpush.msra.mxu3 %v1743_v41 }
 0x507   :  { %648 = vmatpush.msra.mxu3 %v1747_v7 }
 0x509   :  { %649 = vmatpush.msra.mxu3 %v1751_v51 }
 0x50b   :  { %650 = vmatpush.msra.mxu3 %v1755_v8 }
 0x50c   :  { %651 = vmatmul.f32.vlgmr.msra.gmra.mxu3 %v1519_v13 }
 0x50d   :  { %669 = vmatpush.msrb.mxu3 %v1694_v54 }
 0x50f   :  { %670 = vmatpush.msrb.mxu3 %v1697_v42 }
 0x511   :  { %671 = vmatpush.msrb.mxu3 %v1701_v58 }
 0x513   :  { %672 = vmatpush.msrb.mxu3 %v1705_v48 }
 0x515   :  { %673 = vmatpush.msrb.mxu3 %v1709_v39 }
 0x517   :  { %674 = vmatpush.msrb.mxu3 %v1713_v46 }
 0x519   :  { %675 = vmatpush.msrb.mxu3 %v1717_v43 }
 0x51b   :  { %676 = vmatpush.msrb.mxu3 %v1721_v16 }
 0x51d   :  { %677 = vmatpush.msrb.mxu3 %v1725_v15 }
 0x51f   :  { %678 = vmatpush.msrb.mxu3 %v1729_v18 }
 0x521   :  { %679 = vmatpush.msrb.mxu3 %v1734_v49 }
 0x523   :  { %680 = vmatpush.msrb.mxu3 %v1739_v2 }
 0x525   :  { %681 = vmatpush.msrb.mxu3 %v1743_v41 }
 0x527   :  { %682 = vmatpush.msrb.mxu3 %v1747_v7 }
 0x529   :  { %683 = vmatpush.msrb.mxu3 %v1751_v51 }
 0x52b   :  { %684 = vmatpush.msrb.mxu3 %v1755_v8 }
 0x52c   :  { %685 = vmatmul.f32.vlgmr.msrb.gmra.mxu3 %v1262_v0 }
 0x58f   :  { %v652_v59 = vpop.f32.mrf.mxu3 }
 0x590   :  { %v655_v5 = vsub.f32 %v652_v59, %v1528_v14 }
 0x592   :  { %v656_v37 = vmul.f32 %v655_v5, %v655_v5 }
 0x594   :  { %657 = vadd.xlane.f32.xlu1 %v656_v37 }
 0x5af   :  { %v686_v63 = vpop.f32.mrf.mxu3 }
 0x5b0   :  { %v689_v52 = vsub.f32 %v686_v63, %v1365_v17 }
 0x5b2   :  { %718 = vmatpush.msrb.mxu1 %v689_v52  ;;  %v690_v53 = vmul.f32 %v689_v52, %v689_v52 }
 0x5b3   :  { %1128 = vmatmul.msk.f32.vlgmr.msrb.gmra.mxu1 %vm111_vm0, %v1368_v20 }
 0x5b4   :  { %691 = vadd.xlane.f32.xlu2 %v690_v53 }
 0x5bb   :  { %1129 = vmatmul.msk.f32.gmra.mxu1 %vm111_vm0, %v1372_v21 }
 0x5c3   :  { %1130 = vmatmul.msk.f32.gmra.mxu1 %vm111_vm0, %v1376_v22 }
 0x5cb   :  { %1131 = vmatmul.msk.f32.gmra.mxu1 %vm111_vm0, %v1380_v23 }
 0x5d3   :  { %1132 = vmatmul.msk.f32.gmra.mxu1 %vm111_vm0, %v1384_v24 }
 0x5db   :  { %1133 = vmatmul.msk.f32.gmra.mxu1 %vm111_vm0, %v1388_v25 }
 0x5e3   :  { %1134 = vmatmul.msk.f32.gmra.mxu1 %vm111_vm0, %v1392_v26 }
 0x5eb   :  { %1135 = vmatmul.msk.f32.gmra.mxu1 %vm111_vm0, %v1396_v27 }
 0x5f3   :  { %1136 = vmatmul.msk.f32.gmra.mxu1 %vm111_vm0, %v1400_v28 }
 0x5fb   :  { %1137 = vmatmul.msk.f32.gmra.mxu1 %vm111_vm0, %v1404_v30 }
 0x603   :  { %1138 = vmatmul.msk.f32.gmra.mxu1 %vm111_vm0, %v1408_v31 }
 0x607   :  { %v658_v0 = vpop.xlane.xlu1 %657 }
 0x608   :  { %v659_v17 = vrot.slane %v658_v0, 4 }
 0x60a   :  { %v660_v55 = vadd.f32 %v659_v17, %v658_v0 }
 0x60b   :  { %1139 = vmatmul.msk.f32.gmra.mxu1 %vm111_vm0, %v1412_v32 }
 0x60c   :  { %v661_v3 = vrot.slane %v660_v55, 2 }
 0x60e   :  { %v662_v1 = vadd.f32 %v661_v3, %v660_v55 }
 0x610   :  { %v663_v12 = vrot.slane %v662_v1, 1 }
 0x612   :  { %v664_v40 = vadd.f32 %v663_v12, %v662_v1 }
 0x613   :  { %1140 = vmatmul.msk.f32.gmra.mxu1 %vm111_vm0, %v1416_v33 }
 0x614   :  { %1172 = vpush %v664_v40 }
 0x61b   :  { %1141 = vmatmul.msk.f32.gmra.mxu1 %vm111_vm0, %v1420_v34 }
 0x623   :  { %1142 = vmatmul.msk.f32.gmra.mxu1 %vm111_vm0, %v1424_v35 }
 0x627   :  { %v692_v57 = vpop.xlane.xlu2 %691 }
 0x628   :  { %v693_v6 = vrot.slane %v692_v57, 4 }
 0x62a   :  { %v694_v19 = vadd.f32 %v693_v6, %v692_v57 }
 0x62b   :  { %1143 = vmatmul.msk.f32.gmra.mxu1 %vm111_vm0, %v2046_v29 }
 0x62c   :  { %v695_v11 = vrot.slane %v694_v19, 2 }
 0x62e   :  { %v696_v44 = vadd.f32 %v695_v11, %v694_v19 }
 0x630   :  { %v1811_v36 = vpop.f32.mrf.mxu1  ;;  %v697_v9 = vrot.slane %v696_v44, 1 }
 0x632   :  { %v698_v56 = vadd.f32 %v697_v9, %v696_v44 }
 0x634   :  { %1174 = vpush %v698_v56 }
 0x638   :  { %v1813_v45 = vpop.f32.mrf.mxu1 }
 0x640   :  { %v1815_v4 = vpop.f32.mrf.mxu1 }
 0x645   :  { %s1173_s27 = spop %1172 }
 0x646   :  { %s666_s28 = smul.f32 0.0078125, %s1173_s27 }
 0x648   :  { %v729_v50 = vpop.f32.mrf.mxu1  ;;  %668 = sst [smem:[#allocation4 + $0x2]] %s666_s28 }
 0x650   :  { %v732_v38 = vpop.f32.mrf.mxu1 }
 0x658   :  { %v735_v10 = vpop.f32.mrf.mxu1 }
 0x660   :  { %v738_v62 = vpop.f32.mrf.mxu1 }
 0x665   :  { %s1175_s29 = spop %1174 }
 0x666   :  { %s700_s30 = smul.f32 0.0078125, %s1175_s29 }
 0x668   :  { %702 = sst [smem:[#allocation2 + $0x3]] %s700_s30  ;;  %v741_v60 = vpop.f32.mrf.mxu1 }
 0x670   :  { %v744_v47 = vpop.f32.mrf.mxu1 }
 0x678   :  { %v747_v61 = vpop.f32.mrf.mxu1 }
 0x679   :  { %v777_v9 = vmul.f32 0.015625, %v747_v61 }
 0x680   :  { %v750_v59 = vpop.f32.mrf.mxu1 }
 0x681   :  { %v778_v19 = vmul.f32 0.015625, %v750_v59 }
 0x688   :  { %v753_v5 = vpop.f32.mrf.mxu1 }
 0x689   :  { %v779_v40 = vmul.f32 0.015625, %v753_v5  ;;  %v794_v5 = vmul.f32 0.05, %v778_v19 }
 0x68b   :  { %v795_v56 = vmul.f32 0.05, %v779_v40  ;;  %v1186_v40 = vld [vmem:[%s2036_s1] sm:$0xff] }
 0x68d   :  { %v1836_v61 = vsub.f32 %v1709_v39, %v795_v56  ;;  %v772_v39 = vmul.f32 0.015625, %v732_v38 }
 0x68f   :  { %v788_v38 = vmul.f32 0.05, %v772_v39 }
 0x690   :  { %v756_v37 = vpop.f32.mrf.mxu1 }
 0x691   :  { %v780_v3 = vmul.f32 0.015625, %v756_v37 }
 0x693   :  { %v796_v11 = vmul.f32 0.05, %v780_v3 }
 0x695   :  { %v1831_v59 = vsub.f32 %v1705_v48, %v796_v11  ;;  %v773_v48 = vmul.f32 0.015625, %v735_v10 }
 0x698   :  { %v759_v63 = vpop.f32.mrf.mxu1 }
 0x699   :  { %v781_v17 = vmul.f32 0.015625, %v759_v63  ;;  %v793_v63 = vmul.f32 0.05, %v777_v9 }
 0x69b   :  { %v797_v57 = vmul.f32 0.05, %v781_v17  ;;  %v789_v17 = vmul.f32 0.05, %v773_v48 }
 0x69d   :  { %v1826_v37 = vsub.f32 %v1701_v58, %v797_v57  ;;  %v774_v58 = vmul.f32 0.015625, %v738_v62 }
 0x6a0   :  { %v762_v52 = vpop.f32.mrf.mxu1 }
 0x6a1   :  { %v782_v53 = vmul.f32 0.015625, %v762_v52 }
 0x6a3   :  { %v798_v1 = vmul.f32 0.05, %v782_v53 }
 0x6a5   :  { %v1821_v44 = vsub.f32 %v1697_v42, %v798_v1  ;;  %v775_v42 = vmul.f32 0.015625, %v741_v60  ;;  %v1846_v60 = vsub.f32 %v1717_v43, %v793_v63  ;;  %v770_v43 = vmul.f32 0.015625, %v1815_v4 }
 0x6a6   :  { %v768_v4 = vmul.f32 0.015625, %v1811_v36 }
 0x6a7   :  { %v791_v53 = vmul.f32 0.05, %v775_v42  ;;  %v786_v3 = vmul.f32 0.05, %v770_v43 }
 0x6a8   :  { %v765_v0 = vpop.f32.mrf.mxu1 }
 0x6a9   :  { %v783_v55 = vmul.f32 0.015625, %v765_v0  ;;  %v790_v0 = vmul.f32 0.05, %v774_v58  ;;  %v1856_v10 = vsub.f32 %v1725_v15, %v791_v53  ;;  %v1868_v15 = vsub.f32 %v1734_v49, %v789_v17 }
 0x6aa   :  { %v784_v49 = vmul.f32 0.05, %v768_v4 }
 0x6ab   :  { %v799_v12 = vmul.f32 0.05, %v783_v55  ;;  %v1862_v55 = vsub.f32 %v1729_v18, %v790_v0  ;;  %v1874_v18 = vsub.f32 %v1739_v2, %v788_v38 }
 0x6ad   :  { %v1818_v6 = vsub.f32 %v1694_v54, %v799_v12  ;;  %v776_v54 = vmul.f32 0.015625, %v744_v47  ;;  %v1841_v47 = vsub.f32 %v1713_v46, %v794_v5  ;;  %v771_v46 = vmul.f32 0.015625, %v729_v50 }
 0x6ae   :  { %v1884_v12 = vsub.f32 %v1747_v7, %v786_v3  ;;  %v1185_v7 = vld [vmem:[%s2035_s0] sm:$0xff] }
 0x6af   :  { %816 = vmatpush.msra.mxu3 %v1818_v6  ;;  %850 = vmatpush.msra.mxu2 %v1818_v6  ;;  %v792_v52 = vmul.f32 0.05, %v776_v54  ;;  %v787_v50 = vmul.f32 0.05, %v771_v46 }
 0x6b1   :  { %817 = vmatpush.msra.mxu3 %v1821_v44  ;;  %851 = vmatpush.msra.mxu2 %v1821_v44  ;;  %v1851_v62 = vsub.f32 %v1721_v16, %v792_v52  ;;  %v769_v16 = vmul.f32 0.015625, %v1813_v45  ;;  %v1879_v45 = vsub.f32 %v1743_v41, %v787_v50  ;;  %v800_v41 = vsub.f32 %v1755_v8, %v784_v49 }
 0x6b3   :  { %818 = vmatpush.msra.mxu3 %v1826_v37  ;;  %852 = vmatpush.msra.mxu2 %v1826_v37  ;;  %v785_v1 = vmul.f32 0.05, %v769_v16 }
 0x6b5   :  { %819 = vmatpush.msra.mxu3 %v1831_v59  ;;  %853 = vmatpush.msra.mxu2 %v1831_v59  ;;  %v1889_v2 = vsub.f32 %v1751_v51, %v785_v1 }
 0x6b7   :  { %820 = vmatpush.msra.mxu3 %v1836_v61  ;;  %854 = vmatpush.msra.mxu2 %v1836_v61 }
 0x6b9   :  { %821 = vmatpush.msra.mxu3 %v1841_v47  ;;  %855 = vmatpush.msra.mxu2 %v1841_v47 }
 0x6bb   :  { %822 = vmatpush.msra.mxu3 %v1846_v60  ;;  %856 = vmatpush.msra.mxu2 %v1846_v60 }
 0x6bd   :  { %823 = vmatpush.msra.mxu3 %v1851_v62  ;;  %857 = vmatpush.msra.mxu2 %v1851_v62 }
 0x6bf   :  { %824 = vmatpush.msra.mxu3 %v1856_v10  ;;  %858 = vmatpush.msra.mxu2 %v1856_v10 }
 0x6c1   :  { %825 = vmatpush.msra.mxu3 %v1862_v55  ;;  %859 = vmatpush.msra.mxu2 %v1862_v55 }
 0x6c3   :  { %826 = vmatpush.msra.mxu3 %v1868_v15  ;;  %860 = vmatpush.msra.mxu2 %v1868_v15 }
 0x6c5   :  { %827 = vmatpush.msra.mxu3 %v1874_v18  ;;  %861 = vmatpush.msra.mxu2 %v1874_v18 }
 0x6c7   :  { %828 = vmatpush.msra.mxu3 %v1879_v45  ;;  %862 = vmatpush.msra.mxu2 %v1879_v45 }
 0x6c9   :  { %829 = vmatpush.msra.mxu3 %v1884_v12  ;;  %863 = vmatpush.msra.mxu2 %v1884_v12 }
 0x6cb   :  { %830 = vmatpush.msra.mxu3 %v1889_v2  ;;  %864 = vmatpush.msra.mxu2 %v1889_v2 }
 0x6cd   :  { %831 = vmatpush.msra.mxu3 %v800_v41  ;;  %865 = vmatpush.msra.mxu2 %v800_v41 }
 0x6ce   :  { %866 = vmatmul.f32.vlgmr.msra.gmra.mxu2 %v1185_v7  ;;  %832 = vmatmul.f32.vlgmr.msra.gmra.mxu3 %v1519_v13 }
 0x751   :  { %v867_v51 = vpop.f32.mrf.mxu2  ;;  %v833_v36 = vpop.f32.mrf.mxu3 }
 0x752   :  { %v870_v8 = vsub.f32 %v867_v51, %v1186_v40  ;;  %v836_v57 = vsub.f32 %v833_v36, %v1528_v14 }
 0x754   :  { %899 = vmatpush.msrb.mxu2 %v870_v8  ;;  %1161 = vmatpush.msrb.mxu3 %v870_v8  ;;  %v837_v19 = vmul.f32 %v836_v57, %v836_v57  ;;  %v871_v11 = vmul.f32 %v870_v8, %v870_v8 }
 0x755   :  { %1144 = vmatmul.msk.f32.vlgmr.msrb.gmra.mxu2 %vm111_vm0, %v1368_v20  ;;  %1151 = vmatmul.msk.f32.vlgmr.msrb.gmra.mxu3 %vm111_vm0, %v1396_v27 }
 0x756   :  { %872 = vadd.xlane.f32.xlu2 %v871_v11  ;;  %838 = vadd.xlane.f32.xlu1 %v837_v19 }
 0x75d   :  { %1145 = vmatmul.msk.f32.gmra.mxu2 %vm111_vm0, %v1372_v21  ;;  %1152 = vmatmul.msk.f32.gmra.mxu3 %vm111_vm0, %v1400_v28 }
 0x765   :  { %1146 = vmatmul.msk.f32.gmra.mxu2 %vm111_vm0, %v1376_v22  ;;  %1153 = vmatmul.msk.f32.gmra.mxu3 %vm111_vm0, %v1404_v30 }
 0x76d   :  { %1147 = vmatmul.msk.f32.gmra.mxu2 %vm111_vm0, %v1380_v23  ;;  %1154 = vmatmul.msk.f32.gmra.mxu3 %vm111_vm0, %v1408_v31 }
 0x775   :  { %1148 = vmatmul.msk.f32.gmra.mxu2 %vm111_vm0, %v1384_v24  ;;  %1155 = vmatmul.msk.f32.gmra.mxu3 %vm111_vm0, %v1412_v32 }
 0x77d   :  { %1149 = vmatmul.msk.f32.gmra.mxu2 %vm111_vm0, %v1388_v25  ;;  %1156 = vmatmul.msk.f32.gmra.mxu3 %vm111_vm0, %v1416_v33 }
 0x785   :  { %1150 = vmatmul.msk.f32.gmra.mxu2 %vm111_vm0, %v1392_v26  ;;  %1157 = vmatmul.msk.f32.gmra.mxu3 %vm111_vm0, %v1420_v34 }
 0x78d   :  { %1158 = vmatmul.msk.f32.gmra.mxu3 %vm111_vm0, %v1424_v35 }
 0x795   :  { %1159 = vmatmul.msk.f32.gmra.mxu3 %vm111_vm0, %v2046_v29 }
 0x7c9   :  { %v873_v20 = vpop.xlane.xlu2 %872  ;;  %v839_v21 = vpop.xlane.xlu1 %838 }
 0x7ca   :  { %v874_v22 = vrot.slane %v873_v20, 4  ;;  %v840_v23 = vrot.slane %v839_v21, 4 }
 0x7cc   :  { %v875_v24 = vadd.f32 %v874_v22, %v873_v20  ;;  %v841_v25 = vadd.f32 %v840_v23, %v839_v21 }
 0x7ce   :  { %v876_v27 = vrot.slane %v875_v24, 2  ;;  %v842_v28 = vrot.slane %v841_v25, 2 }
 0x7d0   :  { %v877_v30 = vadd.f32 %v876_v27, %v875_v24  ;;  %v843_v31 = vadd.f32 %v842_v28, %v841_v25 }
 0x7d2   :  { %v844_v26 = vrot.slane %v843_v31, 1  ;;  %v878_v32 = vrot.slane %v877_v30, 1 }
 0x7d4   :  { %v845_v33 = vadd.f32 %v844_v26, %v843_v31  ;;  %v879_v34 = vadd.f32 %v878_v32, %v877_v30 }
 0x7d6   :  { %1176 = vpush %v845_v33 }
 0x7d7   :  { %1178 = vpush %v879_v34 }
 0x7d8   :  { %v901_v35 = vpop.f32.mrf.mxu2  ;;  %v922_v13 = vpop.f32.mrf.mxu3 }
 0x7d9   :  { %v949_v14 = vmul.f32 0.015625, %v901_v35  ;;  %v956_v29 = vmul.f32 0.015625, %v922_v13 }
 0x7db   :  { %v965_v9 = vmul.f32 0.05, %v949_v14  ;;  %v972_v56 = vmul.f32 0.05, %v956_v29  ;;  %v1188_v14 = vld [vmem:[%s2038_s3] sm:$0xff] }
 0x7dd   :  { %v1936_v54 = vsub.f32 %v800_v41, %v965_v9  ;;  %v1939_v5 = vsub.f32 %v1856_v10, %v972_v56 }
 0x7df   :  { %1031 = vst [vmem:[%s2042_s7] sm:$0xff] %v1936_v54 }
 0x7e0   :  { %1038 = vst [vmem:[%s2042_s7 + $0x38] sm:$0xff] %v1939_v5  ;;  %v904_v42 = vpop.f32.mrf.mxu2  ;;  %v925_v63 = vpop.f32.mrf.mxu3 }
 0x7e1   :  { %v950_v58 = vmul.f32 0.015625, %v904_v42  ;;  %v957_v52 = vmul.f32 0.015625, %v925_v63 }
 0x7e3   :  { %v966_v48 = vmul.f32 0.05, %v950_v58  ;;  %v973_v53 = vmul.f32 0.05, %v957_v52 }
 0x7e5   :  { %v1950_v39 = vsub.f32 %v1889_v2, %v966_v48  ;;  %v1953_v0 = vsub.f32 %v1851_v62, %v973_v53 }
 0x7e7   :  { %1032 = vst [vmem:[%s2042_s7 + $0x8] sm:$0xff] %v1950_v39 }
 0x7e8   :  { %1039 = vst [vmem:[%s2042_s7 + $0x40] sm:$0xff] %v1953_v0  ;;  %v907_v46 = vpop.f32.mrf.mxu2  ;;  %v928_v17 = vpop.f32.mrf.mxu3 }
 0x7e9   :  { %v951_v10 = vmul.f32 0.015625, %v907_v46  ;;  %v958_v43 = vmul.f32 0.015625, %v928_v17 }
 0x7eb   :  { %v967_v38 = vmul.f32 0.05, %v951_v10  ;;  %v974_v16 = vmul.f32 0.05, %v958_v43 }
 0x7ed   :  { %v1964_v50 = vsub.f32 %v1884_v12, %v967_v38  ;;  %v1967_v62 = vsub.f32 %v1846_v60, %v974_v16 }
 0x7ef   :  { %1033 = vst [vmem:[%s2042_s7 + $0x10] sm:$0xff] %v1964_v50 }
 0x7f0   :  { %1040 = vst [vmem:[%s2042_s7 + $0x48] sm:$0xff] %v1967_v62  ;;  %v910_v4 = vpop.f32.mrf.mxu2  ;;  %v931_v3 = vpop.f32.mrf.mxu3 }
 0x7f1   :  { %v952_v1 = vmul.f32 0.015625, %v910_v4  ;;  %v959_v49 = vmul.f32 0.015625, %v931_v3 }
 0x7f3   :  { %v968_v2 = vmul.f32 0.05, %v952_v1  ;;  %v975_v12 = vmul.f32 0.05, %v959_v49 }
 0x7f5   :  { %v984_v41 = vsub.f32 %v1879_v45, %v968_v2  ;;  %v991_v60 = vsub.f32 %v1841_v47, %v975_v12 }
 0x7f7   :  { %1034 = vst [vmem:[%s2042_s7 + $0x18] sm:$0xff] %v984_v41 }
 0x7f8   :  { %1041 = vst [vmem:[%s2042_s7 + $0x50] sm:$0xff] %v991_v60  ;;  %v913_v7 = vpop.f32.mrf.mxu2  ;;  %v934_v51 = vpop.f32.mrf.mxu3 }
 0x7f9   :  { %v953_v36 = vmul.f32 0.015625, %v913_v7  ;;  %v960_v40 = vmul.f32 0.015625, %v934_v51 }
 0x7fb   :  { %v969_v8 = vmul.f32 0.05, %v953_v36  ;;  %v976_v57 = vmul.f32 0.05, %v960_v40 }
 0x7fd   :  { %v985_v19 = vsub.f32 %v1874_v18, %v969_v8  ;;  %v992_v45 = vsub.f32 %v1836_v61, %v976_v57 }
 0x7ff   :  { %1035 = vst [vmem:[%s2042_s7 + $0x20] sm:$0xff] %v985_v19 }
 0x800   :  { %1042 = vst [vmem:[%s2042_s7 + $0x58] sm:$0xff] %v992_v45  ;;  %v916_v47 = vpop.f32.mrf.mxu2  ;;  %v937_v11 = vpop.f32.mrf.mxu3 }
 0x801   :  { %v954_v20 = vmul.f32 0.015625, %v916_v47  ;;  %v961_v21 = vmul.f32 0.015625, %v937_v11 }
 0x803   :  { %v970_v22 = vmul.f32 0.05, %v954_v20  ;;  %v977_v23 = vmul.f32 0.05, %v961_v21 }
 0x805   :  { %v986_v24 = vsub.f32 %v1868_v15, %v970_v22  ;;  %v993_v18 = vsub.f32 %v1831_v59, %v977_v23 }
 0x807   :  { %1036 = vst [vmem:[%s2042_s7 + $0x28] sm:$0xff] %v986_v24  ;;  %s1177_s8 = spop %1176 }
 0x808   :  { %1043 = vst [vmem:[%s2042_s7 + $0x60] sm:$0xff] %v993_v18  ;;  %v919_v61 = vpop.f32.mrf.mxu2  ;;  %v940_v25 = vpop.f32.mrf.mxu3  ;;  %s847_s11 = smul.f32 0.0078125, %s1177_s8  ;;  %s1179_s0 = spop %1178 }
 0x809   :  { %v955_v27 = vmul.f32 0.015625, %v919_v61  ;;  %v962_v28 = vmul.f32 0.015625, %v940_v25  ;;  %s881_s1 = smul.f32 0.0078125, %s1179_s0 }
 0x80a   :  { %849 = sst [smem:[#allocation4 + $0x3]] %s847_s11 }
 0x80b   :  { %v971_v15 = vmul.f32 0.05, %v955_v27  ;;  %v978_v30 = vmul.f32 0.05, %v962_v28  ;;  %883 = sst [smem:[#allocation2 + $0x4]] %s881_s1 }
 0x80c   :  { %1055 = dma.smem_to_hbm %s1217_s25, 16, %s1053_s24, [#allocation3]  }
 0x80d   :  { %v987_v59 = vsub.f32 %v1862_v55, %v971_v15  ;;  %v994_v31 = vsub.f32 %v1826_v37, %v978_v30 }
 0x80f   :  { %1037 = vst [vmem:[%s2042_s7 + $0x30] sm:$0xff] %v987_v59 }
 0x810   :  { %1044 = vst [vmem:[%s2042_s7 + $0x68] sm:$0xff] %v994_v31  ;;  %v943_v26 = vpop.f32.mrf.mxu3 }
 0x811   :  { %v963_v32 = vmul.f32 0.015625, %v943_v26 }
 0x813   :  { %v979_v33 = vmul.f32 0.05, %v963_v32 }
 0x815   :  { %v995_v34 = vsub.f32 %v1821_v44, %v979_v33 }
 0x817   :  { %1045 = vst [vmem:[%s2042_s7 + $0x70] sm:$0xff] %v995_v34 }
 0x818   :  { %v946_v55 = vpop.f32.mrf.mxu3 }
 0x819   :  { %v964_v35 = vmul.f32 0.015625, %v946_v55 }
 0x81b   :  { %v980_v37 = vmul.f32 0.05, %v964_v35 }
 0x81d   :  { %v996_v13 = vsub.f32 %v1818_v6, %v980_v37  ;;  %v1187_v6 = vld [vmem:[%s2037_s2] sm:$0xff] }
 0x81f   :  { %1046 = vst [vmem:[%s2042_s7 + $0x78] sm:$0xff] %v996_v13  ;;  %997 = vmatpush.msra.mxu0 %v996_v13 }
 0x821   :  { %998 = vmatpush.msra.mxu0 %v995_v34 }
 0x823   :  { %999 = vmatpush.msra.mxu0 %v994_v31 }
 0x825   :  { %1000 = vmatpush.msra.mxu0 %v993_v18 }
 0x827   :  { %1001 = vmatpush.msra.mxu0 %v992_v45 }
 0x829   :  { %1002 = vmatpush.msra.mxu0 %v991_v60 }
 0x82b   :  { %1003 = vmatpush.msra.mxu0 %v1967_v62 }
 0x82d   :  { %1004 = vmatpush.msra.mxu0 %v1953_v0 }
 0x82f   :  { %1005 = vmatpush.msra.mxu0 %v1939_v5 }
 0x831   :  { %1006 = vmatpush.msra.mxu0 %v987_v59 }
 0x833   :  { %1007 = vmatpush.msra.mxu0 %v986_v24 }
 0x835   :  { %1008 = vmatpush.msra.mxu0 %v985_v19 }
 0x837   :  { %1009 = vmatpush.msra.mxu0 %v984_v41 }
 0x839   :  { %1010 = vmatpush.msra.mxu0 %v1964_v50 }
 0x83b   :  { %1011 = vmatpush.msra.mxu0 %v1950_v39 }
 0x83d   :  { %1012 = vmatpush.msra.mxu0 %v1936_v54 }
 0x83e   :  { %1013 = vmatmul.f32.vlgmr.msra.gmra.mxu0 %v1187_v6 }
 0x8bb   :  { %v1014_v44 = vpop.f32.mrf.mxu0 }
 0x8bc   :  { %v1017_v29 = vsub.f32 %v1014_v44, %v1188_v14 }
 0x8be   :  { %v1018_v9 = vmul.f32 %v1017_v29, %v1017_v29 }
 0x8c0   :  { %1019 = vadd.xlane.f32.xlu1 %v1018_v9 }
 0x933   :  { %v1020_v56 = vpop.xlane.xlu1 %1019 }
 0x934   :  { %v1021_v54 = vrot.slane %v1020_v56, 4 }
 0x936   :  { %v1022_v5 = vadd.f32 %v1021_v54, %v1020_v56 }
 0x938   :  { %v1023_v42 = vrot.slane %v1022_v5, 2 }
 0x93a   :  { %v1024_v63 = vadd.f32 %v1023_v42, %v1022_v5 }
 0x93c   :  { %v1025_v58 = vrot.slane %v1024_v63, 1 }
 0x93e   :  { %v1026_v52 = vadd.f32 %v1025_v58, %v1024_v63 }
 0x940   :  { %1180 = vpush %v1026_v52 }
 0x971   :  { %s1181_s27 = spop %1180 }
 0x972   :  { %s1028_s28 = smul.f32 0.0078125, %s1181_s27 }
 0x974   :  { %1030 = sst [smem:[#allocation4 + $0x4]] %s1028_s28 }
 0x975   :  { %1064 = dma.smem_to_hbm %s1218_s5, 16, %s1062_s26, [#allocation5]  }
 0x976   :  { %1213 = dma.done.wait [#allocation3], 16  }
 0x977   :  { %1214 = vsyncadd [#allocation3], 4294967280 }
 0x978   :  { %1215 = dma.done.wait [#allocation5], 16  }
 0x979   :  { %1216 = vsyncadd [#allocation5], 4294967280 }
 0x97a   :  { %1077 = sfence }
 0x97b   :  { %1078 = vsyncpa [#allocation3], 1 }
 0x97c   :  { %1079 = vsyncpa [#allocation5], 1 }

</bundles_post_ra>
